<compile_context>
chip_gen: v7x
topology: tpu7x:2x2x1
jax: 0.10.0
libtpu: 0.0.40
codegen_flags: <defaults>
</compile_context>

<pallas_src>
import jax
import jax.numpy as jnp
from jax.experimental import pallas as pl
from jax.experimental.pallas import tpu as pltpu

# --- module config: ConformerConvolution(dim=32, expansion_factor=2, kernel_size=31) ---
DIM = 32
EXPANSION = 2
INNER = DIM * EXPANSION          # 64
KSIZE = 31
PAD = (KSIZE - 1) // 2           # 15
GROUPS = INNER // 8              # groups = inner_dim // 8 -> 8
CPG = INNER // GROUPS            # channels per group -> 8
LN_EPS = 1e-5
BN_EPS = 1e-5

B = 2                            # batch
S = 16                           # seq_len

K2 = KSIZE + 1                   # 32: taps padded so the slab width is a multiple of 128
KW = K2 * INNER                  # 2048 lanes in the im2col slab
ROLL_OFF = INNER // 2            # 32: keeps both strided-roll base shifts nonzero


def conformer_conv_kernel(x_ref, w1_ref, b1_ref, wd_hbm, dsh_ref, w2_ref, b2_ref,
                          o_ref, wd_vmem, wd_sem):
    # Kick off the 256 KiB depthwise-weight DMA immediately; it overlaps with the
    # LayerNorm / pointwise_conv1 / GLU / slab-construction phase below.
    wd_copy = pltpu.make_async_copy(wd_hbm, wd_vmem, wd_sem)
    wd_copy.start()

    x = x_ref[...].astype(jnp.float32)                        # [B*S, DIM] (time-reversed rows)

    # ---- LayerNorm over channels (gamma/beta folded into w1/b1 in the wrapper) ----
    mu = jnp.mean(x, axis=-1, keepdims=True)
    xc = x - mu
    var = jnp.mean(xc * xc, axis=-1, keepdims=True)
    xn = (xc * jax.lax.rsqrt(var + LN_EPS)).astype(jnp.bfloat16)

    # ---- pointwise_conv1: fused value|gate matmul (128-lane result) + GLU ----
    h12 = jnp.dot(xn, w1_ref[...], preferred_element_type=jnp.float32) + b1_ref[...]
    hv = h12[:, :INNER]
    hg = h12[:, INNER:]
    h = hv * jax.nn.sigmoid(hg)                               # [B*S, INNER] f32

    # ---- grouped conv along time as ONE deep-K matmul ----
    # im2col slab built with two strided rolls + one sublane-sum per batch:
    #   roll 1: row s of h[b] -> lane offset 64*s - 32 (mod 2048)
    #   sum   : collapse the 16 spread rows into one flattened sequence row
    #   roll 2: output row i -> flattened row shifted to lane offset 64*i
    # Valid because KSIZE >= 2*S - 1 (every row's window covers the whole sequence);
    # zero padding comes from the empty lanes, so batches never mix.
    zeros_left = jnp.zeros((S, KW - INNER), jnp.float32)
    slabs = []
    for b in range(B):                                        # static (B=2)
        hb = h[b * S:(b + 1) * S, :]                          # aligned sublane slice [S, INNER]
        placed = jnp.concatenate([zeros_left, hb], axis=1)    # h[b][s] at lanes [KW-64, KW)
        spread = pltpu.roll(placed, ROLL_OFF, 1,
                            stride=INNER, stride_axis=0)      # row s: +(32 + 64*s) lanes
        flat = jnp.sum(spread, axis=0, keepdims=True)         # [1, KW] flattened h[b] (-32 lanes)
        bcast = jnp.broadcast_to(flat, (S, KW))
        slab = pltpu.roll(bcast, ROLL_OFF, 1,
                          stride=INNER, stride_axis=0)        # row i: +(32 + 64*i) lanes
        slabs.append(slab.astype(jnp.bfloat16))
    lhs = jnp.concatenate(slabs, axis=0)                      # [B*S, KW] bf16

    wd_copy.wait()                                            # weight needed only now
    acc = jnp.dot(lhs, wd_vmem[...], preferred_element_type=jnp.float32)   # [B*S, INNER]

    # ---- BatchNorm (folded) + SiLU ----
    y = acc + dsh_ref[...]
    y = (y * jax.nn.sigmoid(y)).astype(jnp.bfloat16)

    # ---- pointwise_conv2 ----
    out = jnp.dot(y, w2_ref[...], preferred_element_type=jnp.float32) + b2_ref[...]
    o_ref[...] = out.astype(o_ref.dtype)                      # [B*S, DIM], normal time order


def conformer_convolution(x, p):
    """x: [B, S, DIM] float32 -> [B, S, DIM]. Single kernel invocation."""
    Bx, Sx, Dx = x.shape
    assert (Bx, Sx, Dx) == (B, S, DIM)
    assert KSIZE >= 2 * S - 1, "single-window slab build requires KSIZE >= 2*S-1"

    # Feed the sequence time-reversed (the depthwise taps are flipped to match in
    # init_params): this makes both strided rolls use a positive per-sublane stride
    # and the kernel output already comes out in normal time order.  Pure layout
    # plumbing on a tiny array, done by XLA outside the kernel.
    xf = x[:, ::-1, :].reshape(Bx * Sx, Dx)

    def full(arr):
        n = arr.ndim
        return pl.BlockSpec(arr.shape, lambda i, _n=n: (0,) * _n)

    in_specs = [
        full(xf), full(p["w1"]), full(p["b1"]),
        pl.BlockSpec(memory_space=pl.ANY),        # depthwise weight: manual async DMA
        full(p["dshift"]), full(p["w2"]), full(p["b2"]),
    ]

    grid_spec = pltpu.PrefetchScalarGridSpec(
        num_scalar_prefetch=0,
        grid=(1,),                                # single step: no per-batch pipeline overhead
        in_specs=in_specs,
        out_specs=pl.BlockSpec((Bx * Sx, Dx), lambda i: (0, 0)),
        scratch_shapes=[
            pltpu.VMEM((K2 * INNER, INNER), jnp.bfloat16),   # depthwise weight landing buffer
            pltpu.SemaphoreType.DMA(()),
        ],
    )
    out = pl.pallas_call(
        conformer_conv_kernel,
        out_shape=jax.ShapeDtypeStruct((Bx * Sx, Dx), x.dtype),
        grid_spec=grid_spec,
        compiler_params=pltpu.CompilerParams(dimension_semantics=("arbitrary",)),
    )(xf, p["w1"], p["b1"], p["wd"], p["dshift"], p["w2"], p["b2"])
    return out.reshape(Bx, Sx, Dx)


# ----------------------------- parameter setup (glue) -----------------------------
def init_params(key):
    ks = jax.random.split(key, 12)
    u = lambda k, shape, s=0.1: jax.random.uniform(k, shape, jnp.float32, -s, s)

    raw = dict(
        ln_g=1.0 + u(ks[0], (DIM,)),
        ln_b=u(ks[1], (DIM,)),
        w1_t=u(ks[2], (2 * INNER, DIM)),          # torch conv1 weight [2*inner, dim, 1] (squeezed)
        b1=u(ks[3], (2 * INNER,)),
        wd_t=u(ks[4], (INNER, CPG, KSIZE)),       # torch grouped conv weight [inner, 8, K]
        bd=u(ks[5], (INNER,)),
        bn_g=1.0 + u(ks[6], (INNER,)),
        bn_b=u(ks[7], (INNER,)),
        bn_mean=u(ks[8], (INNER,)),
        bn_var=1.0 + jnp.abs(u(ks[9], (INNER,))),
        w2_t=u(ks[10], (DIM, INNER)),             # torch conv2 weight [dim, inner, 1] (squeezed)
        b2=u(ks[11], (DIM,)),
    )

    # --- fold LayerNorm affine into pointwise_conv1; fuse value|gate into one weight ---
    w1v = raw["w1_t"][:INNER].T                               # [DIM, INNER] (GLU value half)
    w1g = raw["w1_t"][INNER:].T                               # [DIM, INNER] (GLU gate half)
    w1 = jnp.concatenate(
        [raw["ln_g"][:, None] * w1v, raw["ln_g"][:, None] * w1g], axis=1)   # [DIM, 2*INNER]
    b1 = jnp.concatenate(
        [raw["b1"][:INNER] + raw["ln_b"] @ w1v,
         raw["b1"][INNER:] + raw["ln_b"] @ w1g]).reshape(1, 2 * INNER)

    # --- expand grouped conv taps into block-diagonal dense [K, INNER, INNER] ---
    # dense[k, g*8+c, g*8+o] = wd_t[g*8+o, c, k]
    blocks = raw["wd_t"].reshape(GROUPS, CPG, CPG, KSIZE)      # [g, o, c, k]
    blocks = jnp.transpose(blocks, (3, 0, 2, 1))               # [k, g, c, o]
    eye = jnp.eye(GROUPS, dtype=jnp.float32)
    wd_dense = (blocks[:, :, :, None, :] *
                eye[None, :, None, :, None]).reshape(KSIZE, INNER, INNER)
    # Tap order flipped (kernel consumes a time-reversed sequence) + one zero pad tap
    # so the slab width K2*INNER is a multiple of 128.
    wd_dense = jnp.concatenate(
        [wd_dense[::-1], jnp.zeros((K2 - KSIZE, INNER, INNER), jnp.float32)], axis=0)

    # --- fold BatchNorm (inference) scale into depthwise weight, shift into one vector ---
    inv_std = 1.0 / jnp.sqrt(raw["bn_var"] + BN_EPS)
    bn_scale = raw["bn_g"] * inv_std
    bn_shift = raw["bn_b"] - raw["bn_mean"] * bn_scale

    kernel_params = dict(
        w1=w1.astype(jnp.bfloat16),
        b1=b1,
        wd=(wd_dense * bn_scale[None, None, :]).reshape(K2 * INNER, INNER).astype(jnp.bfloat16),
        dshift=(raw["bd"] * bn_scale + bn_shift).reshape(1, INNER),
        w2=raw["w2_t"].T.astype(jnp.bfloat16),                 # [INNER, DIM]
        b2=raw["b2"].reshape(1, DIM),
    )
    return raw, kernel_params


# -------------------- pure-JAX reference (mirrors the PyTorch module) --------------------
def torch_reference(x, raw):
    mu = x.mean(-1, keepdims=True)
    var = ((x - mu) ** 2).mean(-1, keepdims=True)
    xn = (x - mu) / jnp.sqrt(var + LN_EPS) * raw["ln_g"] + raw["ln_b"]
    xc = jnp.transpose(xn, (0, 2, 1))                          # [B, DIM, S]
    h2 = jnp.einsum("oi,bis->bos", raw["w1_t"], xc) + raw["b1"][None, :, None]
    h = h2[:, :INNER] * jax.nn.sigmoid(h2[:, INNER:])          # GLU(dim=1)
    y = jax.lax.conv_general_dilated(
        h, raw["wd_t"], window_strides=(1,), padding=[(PAD, PAD)],
        dimension_numbers=("NCH", "OIH", "NCH"),
        feature_group_count=GROUPS) + raw["bd"][None, :, None]
    y = (y - raw["bn_mean"][None, :, None]) / jnp.sqrt(raw["bn_var"] + BN_EPS)[None, :, None]
    y = y * raw["bn_g"][None, :, None] + raw["bn_b"][None, :, None]
    y = y * jax.nn.sigmoid(y)                                  # SiLU
    out = jnp.einsum("oi,bis->bos", raw["w2_t"], y) + raw["b2"][None, :, None]
    return jnp.transpose(out, (0, 2, 1))                       # [B, S, DIM]


if __name__ == "__main__":
    key = jax.random.PRNGKey(0)
    kx, kp = jax.random.split(key)
    x = jax.random.normal(kx, (B, S, DIM), jnp.float32)
    raw, params = init_params(kp)

    out = conformer_convolution(x, params)
    out = jax.block_until_ready(out)

    ref = jax.block_until_ready(torch_reference(x, raw))
    assert out.shape == (B, S, DIM)
    assert jnp.allclose(out, ref, atol=1e-2, rtol=1e-2), "mismatch vs reference"
    print("KERNEL_OK")
</pallas_src>

<mosaic_0001>
module attributes {stable_mosaic.version = 11 : i64} {
  func.func @conformer_conv_kernel(%arg0: i32, %arg1: memref<32x32xf32, #tpu.memory_space<vmem>>, %arg2: memref<32x128xbf16, #tpu.memory_space<vmem>>, %arg3: memref<1x128xf32, #tpu.memory_space<vmem>>, %arg4: memref<2048x64xbf16, #tpu.memory_space<any>>, %arg5: memref<1x64xf32, #tpu.memory_space<vmem>>, %arg6: memref<64x32xbf16, #tpu.memory_space<vmem>>, %arg7: memref<1x32xf32, #tpu.memory_space<vmem>>, %arg8: memref<32x32xf32, #tpu.memory_space<vmem>>, %arg9: memref<2048x64xbf16, #tpu.memory_space<vmem>>, %arg10: memref<!tpu.dma_semaphore, #tpu.memory_space<semaphore_mem>>) attributes {dimension_semantics = [#tpu.dimension_semantics<arbitrary>], iteration_bounds = array<i64: 1>, scalar_prefetch = 0 : i64, scratch_operands = 2 : i64, tpu.core_type = #tpu.core_type<tc>, window_params = [{pipeline_mode = #tpu.pipeline_mode<synchronous>, transform_indices = @transform_0, window_bounds = array<i64: 32, 32>}, {pipeline_mode = #tpu.pipeline_mode<synchronous>, transform_indices = @transform_1, window_bounds = array<i64: 32, 128>}, {pipeline_mode = #tpu.pipeline_mode<synchronous>, transform_indices = @transform_2, window_bounds = array<i64: 1, 128>}, {}, {pipeline_mode = #tpu.pipeline_mode<synchronous>, transform_indices = @transform_4, window_bounds = array<i64: 1, 64>}, {pipeline_mode = #tpu.pipeline_mode<synchronous>, transform_indices = @transform_5, window_bounds = array<i64: 64, 32>}, {pipeline_mode = #tpu.pipeline_mode<synchronous>, transform_indices = @transform_6, window_bounds = array<i64: 1, 32>}, {pipeline_mode = #tpu.pipeline_mode<synchronous>, transform_indices = @transform_7, window_bounds = array<i64: 32, 32>}]} {
    tpu.enqueue_dma source(%arg4 : memref<2048x64xbf16, #tpu.memory_space<any>>) target(%arg9 : memref<2048x64xbf16, #tpu.memory_space<vmem>>) target_semaphore(%arg10 : memref<!tpu.dma_semaphore, #tpu.memory_space<semaphore_mem>>)
    %c0 = arith.constant 0 : index
    %c0_0 = arith.constant 0 : index
    %0 = vector.load %arg1[%c0, %c0_0] : memref<32x32xf32, #tpu.memory_space<vmem>>, vector<32x32xf32>
    %cst = arith.constant dense<0.000000e+00> : vector<32xf32>
    %1 = vector.multi_reduction <add>, %0, %cst [1] : vector<32x32xf32> to vector<32xf32>
    %2 = vector.shape_cast %1 : vector<32xf32> to vector<32x1xf32>
    %cst_1 = arith.constant 3.200000e+01 : f32
    %3 = vector.broadcast %cst_1 : f32 to vector<32x1xf32>
    %4 = arith.divf %2, %3 : vector<32x1xf32>
    %5 = vector.broadcast %4 : vector<32x1xf32> to vector<32x32xf32>
    %6 = arith.subf %0, %5 : vector<32x32xf32>
    %7 = arith.mulf %6, %6 : vector<32x32xf32>
    %cst_2 = arith.constant dense<0.000000e+00> : vector<32xf32>
    %8 = vector.multi_reduction <add>, %7, %cst_2 [1] : vector<32x32xf32> to vector<32xf32>
    %9 = vector.shape_cast %8 : vector<32xf32> to vector<32x1xf32>
    %cst_3 = arith.constant 3.200000e+01 : f32
    %10 = vector.broadcast %cst_3 : f32 to vector<32x1xf32>
    %11 = arith.divf %9, %10 : vector<32x1xf32>
    %cst_4 = arith.constant 9.99999974E-6 : f32
    %12 = vector.broadcast %cst_4 : f32 to vector<32x1xf32>
    %13 = arith.addf %11, %12 : vector<32x1xf32>
    %14 = math.rsqrt %13 : vector<32x1xf32>
    %15 = vector.broadcast %14 : vector<32x1xf32> to vector<32x32xf32>
    %16 = arith.mulf %6, %15 : vector<32x32xf32>
    %17 = arith.truncf %16 : vector<32x32xf32> to vector<32x32xbf16>
    %c0_5 = arith.constant 0 : index
    %c0_6 = arith.constant 0 : index
    %18 = vector.load %arg2[%c0_5, %c0_6] : memref<32x128xbf16, #tpu.memory_space<vmem>>, vector<32x128xbf16>
    %cst_7 = arith.constant dense<0.000000e+00> : vector<32x128xf32>
    %19 = tpu.matmul %17, %18, %cst_7 {dimension_numbers = #tpu.dot_dimension_numbers<[1], [0], [0], [1], [0, 0, 1, 1], [], []>} : vector<32x32xbf16>, vector<32x128xbf16>, vector<32x128xf32> -> vector<32x128xf32>
    %c0_8 = arith.constant 0 : index
    %c0_9 = arith.constant 0 : index
    %20 = vector.load %arg3[%c0_8, %c0_9] : memref<1x128xf32, #tpu.memory_space<vmem>>, vector<1x128xf32>
    %21 = vector.broadcast %20 : vector<1x128xf32> to vector<32x128xf32>
    %22 = arith.addf %19, %21 : vector<32x128xf32>
    %23 = vector.extract_strided_slice %22 {offsets = [0, 0], sizes = [32, 64], strides = [1, 1]} : vector<32x128xf32> to vector<32x64xf32>
    %24 = vector.extract_strided_slice %22 {offsets = [0, 64], sizes = [32, 64], strides = [1, 1]} : vector<32x128xf32> to vector<32x64xf32>
    %25 = arith.negf %24 : vector<32x64xf32>
    %26 = math.exp %25 : vector<32x64xf32>
    %cst_10 = arith.constant 1.000000e+00 : f32
    %27 = vector.broadcast %cst_10 : f32 to vector<32x64xf32>
    %28 = arith.addf %27, %26 : vector<32x64xf32>
    %29 = arith.divf %27, %28 : vector<32x64xf32>
    %30 = arith.mulf %23, %29 : vector<32x64xf32>
    %cst_11 = arith.constant 0.000000e+00 : f32
    %31 = vector.broadcast %cst_11 : f32 to vector<16x1984xf32>
    %32 = vector.extract_strided_slice %30 {offsets = [0, 0], sizes = [16, 64], strides = [1, 1]} : vector<32x64xf32> to vector<16x64xf32>
    %33 = tpu.concatenate %31, %32 in 1 : vector<16x1984xf32>, vector<16x64xf32> -> vector<16x2048xf32>
    %c32_i32 = arith.constant 32 : i32
    %34 = tpu.dynamic_rotate %33 by %c32_i32 dim 1 {stride = 64 : si32, stride_dimension = 0 : si32} : vector<16x2048xf32>, i32 -> vector<16x2048xf32>
    %cst_12 = arith.constant dense<0.000000e+00> : vector<2048xf32>
    %35 = vector.multi_reduction <add>, %34, %cst_12 [0] : vector<16x2048xf32> to vector<2048xf32>
    %36 = vector.shape_cast %35 : vector<2048xf32> to vector<1x2048xf32>
    %37 = vector.shape_cast %36 : vector<1x2048xf32> to vector<1x2048xf32>
    %38 = vector.broadcast %37 : vector<1x2048xf32> to vector<16x2048xf32>
    %c32_i32_13 = arith.constant 32 : i32
    %39 = tpu.dynamic_rotate %38 by %c32_i32_13 dim 1 {stride = 64 : si32, stride_dimension = 0 : si32} : vector<16x2048xf32>, i32 -> vector<16x2048xf32>
    %40 = arith.truncf %39 : vector<16x2048xf32> to vector<16x2048xbf16>
    %41 = vector.extract_strided_slice %30 {offsets = [16, 0], sizes = [16, 64], strides = [1, 1]} : vector<32x64xf32> to vector<16x64xf32>
    %42 = tpu.concatenate %31, %41 in 1 : vector<16x1984xf32>, vector<16x64xf32> -> vector<16x2048xf32>
    %c32_i32_14 = arith.constant 32 : i32
    %43 = tpu.dynamic_rotate %42 by %c32_i32_14 dim 1 {stride = 64 : si32, stride_dimension = 0 : si32} : vector<16x2048xf32>, i32 -> vector<16x2048xf32>
    %cst_15 = arith.constant dense<0.000000e+00> : vector<2048xf32>
    %44 = vector.multi_reduction <add>, %43, %cst_15 [0] : vector<16x2048xf32> to vector<2048xf32>
    %45 = vector.shape_cast %44 : vector<2048xf32> to vector<1x2048xf32>
    %46 = vector.shape_cast %45 : vector<1x2048xf32> to vector<1x2048xf32>
    %47 = vector.broadcast %46 : vector<1x2048xf32> to vector<16x2048xf32>
    %c32_i32_16 = arith.constant 32 : i32
    %48 = tpu.dynamic_rotate %47 by %c32_i32_16 dim 1 {stride = 64 : si32, stride_dimension = 0 : si32} : vector<16x2048xf32>, i32 -> vector<16x2048xf32>
    %49 = arith.truncf %48 : vector<16x2048xf32> to vector<16x2048xbf16>
    %50 = tpu.concatenate %40, %49 in 0 : vector<16x2048xbf16>, vector<16x2048xbf16> -> vector<32x2048xbf16>
    tpu.wait_dma2 semaphore(%arg10 : memref<!tpu.dma_semaphore, #tpu.memory_space<semaphore_mem>>) src(%arg4 : memref<2048x64xbf16, #tpu.memory_space<any>>) dst(%arg9 : memref<2048x64xbf16, #tpu.memory_space<vmem>>)
    %c0_17 = arith.constant 0 : index
    %c0_18 = arith.constant 0 : index
    %51 = vector.load %arg9[%c0_17, %c0_18] : memref<2048x64xbf16, #tpu.memory_space<vmem>>, vector<2048x64xbf16>
    %cst_19 = arith.constant dense<0.000000e+00> : vector<32x64xf32>
    %52 = tpu.matmul %50, %51, %cst_19 {dimension_numbers = #tpu.dot_dimension_numbers<[1], [0], [0], [1], [0, 0, 1, 1], [], []>} : vector<32x2048xbf16>, vector<2048x64xbf16>, vector<32x64xf32> -> vector<32x64xf32>
    %c0_20 = arith.constant 0 : index
    %c0_21 = arith.constant 0 : index
    %53 = vector.load %arg5[%c0_20, %c0_21] : memref<1x64xf32, #tpu.memory_space<vmem>>, vector<1x64xf32>
    %54 = vector.broadcast %53 : vector<1x64xf32> to vector<32x64xf32>
    %55 = arith.addf %52, %54 : vector<32x64xf32>
    %56 = arith.negf %55 : vector<32x64xf32>
    %57 = math.exp %56 : vector<32x64xf32>
    %cst_22 = arith.constant 1.000000e+00 : f32
    %58 = vector.broadcast %cst_22 : f32 to vector<32x64xf32>
    %59 = arith.addf %58, %57 : vector<32x64xf32>
    %60 = arith.divf %58, %59 : vector<32x64xf32>
    %61 = arith.mulf %55, %60 : vector<32x64xf32>
    %62 = arith.truncf %61 : vector<32x64xf32> to vector<32x64xbf16>
    %c0_23 = arith.constant 0 : index
    %c0_24 = arith.constant 0 : index
    %63 = vector.load %arg6[%c0_23, %c0_24] : memref<64x32xbf16, #tpu.memory_space<vmem>>, vector<64x32xbf16>
    %cst_25 = arith.constant dense<0.000000e+00> : vector<32x32xf32>
    %64 = tpu.matmul %62, %63, %cst_25 {dimension_numbers = #tpu.dot_dimension_numbers<[1], [0], [0], [1], [0, 0, 1, 1], [], []>} : vector<32x64xbf16>, vector<64x32xbf16>, vector<32x32xf32> -> vector<32x32xf32>
    %c0_26 = arith.constant 0 : index
    %c0_27 = arith.constant 0 : index
    %65 = vector.load %arg7[%c0_26, %c0_27] : memref<1x32xf32, #tpu.memory_space<vmem>>, vector<1x32xf32>
    %66 = vector.broadcast %65 : vector<1x32xf32> to vector<32x32xf32>
    %67 = arith.addf %64, %66 : vector<32x32xf32>
    %c0_28 = arith.constant 0 : index
    %c0_29 = arith.constant 0 : index
    %68 = vector.load %arg8[%c0_28, %c0_29] : memref<32x32xf32, #tpu.memory_space<vmem>>, vector<32x32xf32>
    tpu.vector_store %arg8[%c0_28, %c0_29], %67 {strides = array<i32>} : memref<32x32xf32, #tpu.memory_space<vmem>>, vector<32x32xf32>,
    return
  }
  func.func @transform_0(%arg0: i32) -> (i32, i32) {
    %c0_i32 = arith.constant 0 : i32
    %c0_i32_0 = arith.constant 0 : i32
    %c0_i32_1 = arith.constant 0 : i32
    return %c0_i32, %c0_i32_0 : i32, i32
  }
  func.func @transform_1(%arg0: i32) -> (i32, i32) {
    %c0_i32 = arith.constant 0 : i32
    %c0_i32_0 = arith.constant 0 : i32
    %c0_i32_1 = arith.constant 0 : i32
    return %c0_i32, %c0_i32_0 : i32, i32
  }
  func.func @transform_2(%arg0: i32) -> (i32, i32) {
    %c0_i32 = arith.constant 0 : i32
    %c0_i32_0 = arith.constant 0 : i32
    %c0_i32_1 = arith.constant 0 : i32
    return %c0_i32, %c0_i32_0 : i32, i32
  }
  func.func @transform_4(%arg0: i32) -> (i32, i32) {
    %c0_i32 = arith.constant 0 : i32
    %c0_i32_0 = arith.constant 0 : i32
    %c0_i32_1 = arith.constant 0 : i32
    return %c0_i32, %c0_i32_0 : i32, i32
  }
  func.func @transform_5(%arg0: i32) -> (i32, i32) {
    %c0_i32 = arith.constant 0 : i32
    %c0_i32_0 = arith.constant 0 : i32
    %c0_i32_1 = arith.constant 0 : i32
    return %c0_i32, %c0_i32_0 : i32, i32
  }
  func.func @transform_6(%arg0: i32) -> (i32, i32) {
    %c0_i32 = arith.constant 0 : i32
    %c0_i32_0 = arith.constant 0 : i32
    %c0_i32_1 = arith.constant 0 : i32
    return %c0_i32, %c0_i32_0 : i32, i32
  }
  func.func @transform_7(%arg0: i32) -> (i32, i32) {
    %c0_i32 = arith.constant 0 : i32
    %c0_i32_0 = arith.constant 0 : i32
    %c0_i32_1 = arith.constant 0 : i32
    return %c0_i32, %c0_i32_0 : i32, i32
  }
}

</mosaic_0001>

<bundles_post_ra>
// kernel: tpu_custom_call.1
= control target key start
LH: loop header
LB: loop body
LE: loop exit
PB: predicated region body
PF: predicated region fallthrough
CT: control target
= control target key end

     0   :  { %12 = vsyncpa [#allocation5], 0  ;;  %vm326_vm0 = vcmask 261120   ;;  %s2623_s0 = inlined_call_operand.vmem [shape: f32[32,32], index: 0, kind: input, shape index: {}]   ;;  %s2624_s1 = inlined_call_operand.vmem [shape: bf16[32,128], index: 1, kind: input, shape index: {}]   ;;  %s2625_s2 = inlined_call_operand.vmem [shape: f32[1,128], index: 2, kind: input, shape index: {}]   ;;  %s2626_s3 = inlined_call_operand.vmem [shape: bf16[2048,64], index: 3, kind: input, shape index: {}]   ;;  %s2627_s4 = inlined_call_operand.vmem [shape: f32[1,64], index: 4, kind: input, shape index: {}]   ;;  %s2628_s5 = inlined_call_operand.vmem [shape: bf16[64,32], index: 5, kind: input, shape index: {}]   ;;  %s2629_s6 = inlined_call_operand.vmem [shape: f32[1,32], index: 6, kind: input, shape index: {}]   ;;  %s2630_s7 = inlined_call_operand.hbm [shape: f32[32,32], index: 7, kind: output, shape index: {}]  }
   0x1   :  { %v1706_v0 = vld [vmem:[%s2626_s3] sm:$0xff]  ;;  %v1711_v1 = vld [vmem:[%s2626_s3 + $0x8] sm:$0xff]  ;;  %v1716_v2 = vld [vmem:[%s2626_s3 + $0x10] sm:$0xff] }
   0x2   :  { %v1721_v3 = vld [vmem:[%s2626_s3 + $0x18] sm:$0xff]  ;;  %v1726_v4 = vld [vmem:[%s2626_s3 + $0x20] sm:$0xff]  ;;  %v1731_v5 = vld [vmem:[%s2626_s3 + $0x28] sm:$0xff] }
   0x3   :  { %v1736_v6 = vld [vmem:[%s2626_s3 + $0x30] sm:$0xff]  ;;  %v1741_v7 = vld [vmem:[%s2626_s3 + $0x38] sm:$0xff]  ;;  %v1746_v8 = vld [vmem:[%s2626_s3 + $0x40] sm:$0xff] }
   0x4   :  { %v1751_v9 = vld [vmem:[%s2626_s3 + $0x48] sm:$0xff]  ;;  %v1756_v10 = vld [vmem:[%s2626_s3 + $0x50] sm:$0xff]  ;;  %v1761_v11 = vld [vmem:[%s2626_s3 + $0x58] sm:$0xff] }
   0x5   :  { %v1766_v12 = vld [vmem:[%s2626_s3 + $0x60] sm:$0xff]  ;;  %v1771_v13 = vld [vmem:[%s2626_s3 + $0x68] sm:$0xff]  ;;  %v1776_v14 = vld [vmem:[%s2626_s3 + $0x70] sm:$0xff] }
   0x6   :  { %v1781_v15 = vld [vmem:[%s2626_s3 + $0x78] sm:$0xff]  ;;  %v1786_v16 = vld [vmem:[%s2626_s3 + $0x80] sm:$0xff]  ;;  %v1791_v17 = vld [vmem:[%s2626_s3 + $0x88] sm:$0xff] }
   0x7   :  { %v1796_v18 = vld [vmem:[%s2626_s3 + $0x90] sm:$0xff]  ;;  %v1801_v19 = vld [vmem:[%s2626_s3 + $0x98] sm:$0xff]  ;;  %v1806_v20 = vld [vmem:[%s2626_s3 + $0xa0] sm:$0xff] }
   0x8   :  { %v1811_v21 = vld [vmem:[%s2626_s3 + $0xa8] sm:$0xff]  ;;  %v1816_v22 = vld [vmem:[%s2626_s3 + $0xb0] sm:$0xff]  ;;  %v1821_v23 = vld [vmem:[%s2626_s3 + $0xb8] sm:$0xff] }
   0x9   :  { %v1826_v24 = vld [vmem:[%s2626_s3 + $0xc0] sm:$0xff]  ;;  %v1831_v25 = vld [vmem:[%s2626_s3 + $0xc8] sm:$0xff]  ;;  %v1836_v26 = vld [vmem:[%s2626_s3 + $0xd0] sm:$0xff] }
   0xa   :  { %v1841_v27 = vld [vmem:[%s2626_s3 + $0xd8] sm:$0xff]  ;;  %v1846_v28 = vld [vmem:[%s2626_s3 + $0xe0] sm:$0xff]  ;;  %v1851_v29 = vld [vmem:[%s2626_s3 + $0xe8] sm:$0xff] }
   0xb   :  { %v1856_v30 = vld [vmem:[%s2626_s3 + $0xf0] sm:$0xff]  ;;  %v1861_v31 = vld [vmem:[%s2626_s3 + $0xf8] sm:$0xff]  ;;  %v1866_v32 = vld [vmem:[%s2626_s3 + $0x100] sm:$0xff] }
   0xc   :  { %2631 = vst [vmem:[#allocation9_spill] sm:$0xff] %v1866_v32  ;;  %v1871_v33 = vld [vmem:[%s2626_s3 + $0x108] sm:$0xff]  ;;  %v1876_v34 = vld [vmem:[%s2626_s3 + $0x110] sm:$0xff]  ;;  %v1881_v35 = vld [vmem:[%s2626_s3 + $0x118] sm:$0xff] }
   0xd   :  { %2632 = vst [vmem:[#allocation10_spill] sm:$0xff] %v1871_v33  ;;  %2633 = vst [vmem:[#allocation11_spill] sm:$0xff] %v1876_v34  ;;  %v1886_v36 = vld [vmem:[%s2626_s3 + $0x120] sm:$0xff]  ;;  %v1891_v37 = vld [vmem:[%s2626_s3 + $0x128] sm:$0xff] }
   0xe   :  { %2634 = vst [vmem:[#allocation12_spill] sm:$0xff] %v1881_v35  ;;  %2635 = vst [vmem:[#allocation13_spill] sm:$0xff] %v1886_v36  ;;  %v1896_v38 = vld [vmem:[%s2626_s3 + $0x130] sm:$0xff]  ;;  %v1901_v39 = vld [vmem:[%s2626_s3 + $0x138] sm:$0xff] }
   0xf   :  { %2636 = vst [vmem:[#allocation14_spill] sm:$0xff] %v1891_v37  ;;  %2637 = vst [vmem:[#allocation15_spill] sm:$0xff] %v1896_v38  ;;  %v1906_v40 = vld [vmem:[%s2626_s3 + $0x140] sm:$0xff]  ;;  %v1911_v41 = vld [vmem:[%s2626_s3 + $0x148] sm:$0xff] }
  0x10   :  { %2638 = vst [vmem:[#allocation16_spill] sm:$0xff] %v1901_v39  ;;  %2639 = vst [vmem:[#allocation17_spill] sm:$0xff] %v1911_v41  ;;  %v1916_v42 = vld [vmem:[%s2626_s3 + $0x150] sm:$0xff]  ;;  %v1921_v43 = vld [vmem:[%s2626_s3 + $0x158] sm:$0xff] }
  0x11   :  { %2640 = vst [vmem:[#allocation18_spill] sm:$0xff] %v1916_v42  ;;  %2641 = vst [vmem:[#allocation19_spill] sm:$0xff] %v1921_v43  ;;  %v1926_v44 = vld [vmem:[%s2626_s3 + $0x160] sm:$0xff]  ;;  %v1931_v45 = vld [vmem:[%s2626_s3 + $0x168] sm:$0xff] }
  0x12   :  { %2642 = vst [vmem:[#allocation20_spill] sm:$0xff] %v1926_v44  ;;  %2643 = vst [vmem:[#allocation21_spill] sm:$0xff] %v1931_v45  ;;  %v1936_v46 = vld [vmem:[%s2626_s3 + $0x170] sm:$0xff]  ;;  %v1941_v47 = vld [vmem:[%s2626_s3 + $0x178] sm:$0xff] }
  0x13   :  { %2644 = vst [vmem:[#allocation22_spill] sm:$0xff] %v1936_v46  ;;  %2645 = vst [vmem:[#allocation23_spill] sm:$0xff] %v1941_v47  ;;  %v1946_v48 = vld [vmem:[%s2626_s3 + $0x180] sm:$0xff]  ;;  %v1951_v49 = vld [vmem:[%s2626_s3 + $0x188] sm:$0xff] }
  0x14   :  { %2646 = vst [vmem:[#allocation24_spill] sm:$0xff] %v1946_v48  ;;  %2647 = vst [vmem:[#allocation25_spill] sm:$0xff] %v1951_v49  ;;  %v1956_v50 = vld [vmem:[%s2626_s3 + $0x190] sm:$0xff]  ;;  %v1961_v51 = vld [vmem:[%s2626_s3 + $0x198] sm:$0xff] }
  0x15   :  { %2648 = vst [vmem:[#allocation26_spill] sm:$0xff] %v1956_v50  ;;  %2649 = vst [vmem:[#allocation27_spill] sm:$0xff] %v1961_v51  ;;  %v1966_v52 = vld [vmem:[%s2626_s3 + $0x1a0] sm:$0xff]  ;;  %v1971_v53 = vld [vmem:[%s2626_s3 + $0x1a8] sm:$0xff] }
  0x16   :  { %2650 = vst [vmem:[#allocation28_spill] sm:$0xff] %v1966_v52  ;;  %2651 = vst [vmem:[#allocation29_spill] sm:$0xff] %v1971_v53  ;;  %v1976_v54 = vld [vmem:[%s2626_s3 + $0x1b0] sm:$0xff]  ;;  %v1981_v55 = vld [vmem:[%s2626_s3 + $0x1b8] sm:$0xff] }
  0x17   :  { %2652 = vst [vmem:[#allocation30_spill] sm:$0xff] %v1976_v54  ;;  %2653 = vst [vmem:[#allocation31_spill] sm:$0xff] %v1981_v55  ;;  %v1986_v56 = vld [vmem:[%s2626_s3 + $0x1c0] sm:$0xff]  ;;  %v1991_v57 = vld [vmem:[%s2626_s3 + $0x1c8] sm:$0xff] }
  0x18   :  { %2654 = vst [vmem:[#allocation32_spill] sm:$0xff] %v1986_v56  ;;  %2655 = vst [vmem:[#allocation33_spill] sm:$0xff] %v1991_v57  ;;  %v1996_v58 = vld [vmem:[%s2626_s3 + $0x1d0] sm:$0xff]  ;;  %v2001_v59 = vld [vmem:[%s2626_s3 + $0x1d8] sm:$0xff] }
  0x19   :  { %2656 = vst [vmem:[#allocation34_spill] sm:$0xff] %v1996_v58  ;;  %2657 = vst [vmem:[#allocation35_spill] sm:$0xff] %v2001_v59  ;;  %v2006_v60 = vld [vmem:[%s2626_s3 + $0x1e0] sm:$0xff]  ;;  %v2011_v61 = vld [vmem:[%s2626_s3 + $0x1e8] sm:$0xff] }
  0x1a   :  { %2658 = vst [vmem:[#allocation36_spill] sm:$0xff] %v2006_v60  ;;  %2659 = vst [vmem:[#allocation37_spill] sm:$0xff] %v2011_v61  ;;  %v2016_v62 = vld [vmem:[%s2626_s3 + $0x1f0] sm:$0xff]  ;;  %v2021_v63 = vld [vmem:[%s2626_s3 + $0x1f8] sm:$0xff] }
  0x1b   :  { %2660 = vst [vmem:[#allocation38_spill] sm:$0xff] %v2016_v62  ;;  %2661 = vst [vmem:[#allocation39_spill] sm:$0xff] %v2021_v63  ;;  %v2026_v55 = vld [vmem:[%s2626_s3 + $0x200] sm:$0xff]  ;;  %v2031_v39 = vld [vmem:[%s2626_s3 + $0x208] sm:$0xff] }
  0x1c   :  { %2662 = vst [vmem:[#allocation40_spill] sm:$0xff] %v2026_v55  ;;  %2663 = vst [vmem:[#allocation41_spill] sm:$0xff] %v2031_v39  ;;  %v2036_v47 = vld [vmem:[%s2626_s3 + $0x210] sm:$0xff]  ;;  %v2041_v54 = vld [vmem:[%s2626_s3 + $0x218] sm:$0xff] }
  0x1d   :  { %2664 = vst [vmem:[#allocation42_spill] sm:$0xff] %v2036_v47  ;;  %2665 = vst [vmem:[#allocation43_spill] sm:$0xff] %v2041_v54  ;;  %v2046_v63 = vld [vmem:[%s2626_s3 + $0x220] sm:$0xff]  ;;  %v2051_v55 = vld [vmem:[%s2626_s3 + $0x228] sm:$0xff] }
  0x1e   :  { %2666 = vst [vmem:[#allocation44_spill] sm:$0xff] %v2046_v63  ;;  %2667 = vst [vmem:[#allocation45_spill] sm:$0xff] %v2051_v55  ;;  %v2056_v39 = vld [vmem:[%s2626_s3 + $0x230] sm:$0xff]  ;;  %v2061_v47 = vld [vmem:[%s2626_s3 + $0x238] sm:$0xff] }
  0x1f   :  { %2668 = vst [vmem:[#allocation46_spill] sm:$0xff] %v2056_v39  ;;  %2669 = vst [vmem:[#allocation47_spill] sm:$0xff] %v2061_v47  ;;  %v2066_v54 = vld [vmem:[%s2626_s3 + $0x240] sm:$0xff]  ;;  %v2071_v63 = vld [vmem:[%s2626_s3 + $0x248] sm:$0xff] }
  0x20   :  { %2670 = vst [vmem:[#allocation48_spill] sm:$0xff] %v2066_v54  ;;  %2671 = vst [vmem:[#allocation49_spill] sm:$0xff] %v2071_v63  ;;  %v2076_v55 = vld [vmem:[%s2626_s3 + $0x250] sm:$0xff]  ;;  %v2081_v39 = vld [vmem:[%s2626_s3 + $0x258] sm:$0xff] }
  0x21   :  { %2672 = vst [vmem:[#allocation50_spill] sm:$0xff] %v2076_v55  ;;  %2673 = vst [vmem:[#allocation51_spill] sm:$0xff] %v2081_v39  ;;  %v2086_v47 = vld [vmem:[%s2626_s3 + $0x260] sm:$0xff]  ;;  %v2091_v54 = vld [vmem:[%s2626_s3 + $0x268] sm:$0xff] }
  0x22   :  { %2674 = vst [vmem:[#allocation52_spill] sm:$0xff] %v2086_v47  ;;  %2675 = vst [vmem:[#allocation53_spill] sm:$0xff] %v2091_v54  ;;  %v2096_v63 = vld [vmem:[%s2626_s3 + $0x270] sm:$0xff]  ;;  %v2101_v55 = vld [vmem:[%s2626_s3 + $0x278] sm:$0xff] }
  0x23   :  { %2676 = vst [vmem:[#allocation54_spill] sm:$0xff] %v2096_v63  ;;  %2677 = vst [vmem:[#allocation55_spill] sm:$0xff] %v2101_v55  ;;  %v2106_v39 = vld [vmem:[%s2626_s3 + $0x280] sm:$0xff]  ;;  %v2111_v47 = vld [vmem:[%s2626_s3 + $0x288] sm:$0xff] }
  0x24   :  { %2678 = vst [vmem:[#allocation56_spill] sm:$0xff] %v2106_v39  ;;  %2679 = vst [vmem:[#allocation57_spill] sm:$0xff] %v2111_v47  ;;  %v2116_v54 = vld [vmem:[%s2626_s3 + $0x290] sm:$0xff]  ;;  %v2121_v63 = vld [vmem:[%s2626_s3 + $0x298] sm:$0xff] }
  0x25   :  { %2680 = vst [vmem:[#allocation58_spill] sm:$0xff] %v2116_v54  ;;  %2681 = vst [vmem:[#allocation59_spill] sm:$0xff] %v2121_v63  ;;  %v2126_v55 = vld [vmem:[%s2626_s3 + $0x2a0] sm:$0xff]  ;;  %v2131_v39 = vld [vmem:[%s2626_s3 + $0x2a8] sm:$0xff] }
  0x26   :  { %2682 = vst [vmem:[#allocation60_spill] sm:$0xff] %v2126_v55  ;;  %2683 = vst [vmem:[#allocation61_spill] sm:$0xff] %v2131_v39  ;;  %v2136_v47 = vld [vmem:[%s2626_s3 + $0x2b0] sm:$0xff]  ;;  %v2141_v54 = vld [vmem:[%s2626_s3 + $0x2b8] sm:$0xff] }
  0x27   :  { %2684 = vst [vmem:[#allocation62_spill] sm:$0xff] %v2136_v47  ;;  %2685 = vst [vmem:[#allocation63_spill] sm:$0xff] %v2141_v54  ;;  %v2146_v63 = vld [vmem:[%s2626_s3 + $0x2c0] sm:$0xff]  ;;  %v2151_v55 = vld [vmem:[%s2626_s3 + $0x2c8] sm:$0xff] }
  0x28   :  { %2686 = vst [vmem:[#allocation64_spill] sm:$0xff] %v2146_v63  ;;  %2687 = vst [vmem:[#allocation65_spill] sm:$0xff] %v2151_v55  ;;  %v2156_v39 = vld [vmem:[%s2626_s3 + $0x2d0] sm:$0xff]  ;;  %v2161_v47 = vld [vmem:[%s2626_s3 + $0x2d8] sm:$0xff] }
  0x29   :  { %2688 = vst [vmem:[#allocation66_spill] sm:$0xff] %v2156_v39  ;;  %2689 = vst [vmem:[#allocation67_spill] sm:$0xff] %v2161_v47  ;;  %v2166_v54 = vld [vmem:[%s2626_s3 + $0x2e0] sm:$0xff]  ;;  %v2171_v63 = vld [vmem:[%s2626_s3 + $0x2e8] sm:$0xff] }
  0x2a   :  { %2690 = vst [vmem:[#allocation68_spill] sm:$0xff] %v2166_v54  ;;  %2691 = vst [vmem:[#allocation69_spill] sm:$0xff] %v2171_v63  ;;  %v2176_v55 = vld [vmem:[%s2626_s3 + $0x2f0] sm:$0xff]  ;;  %v2181_v39 = vld [vmem:[%s2626_s3 + $0x2f8] sm:$0xff] }
  0x2b   :  { %2692 = vst [vmem:[#allocation70_spill] sm:$0xff] %v2176_v55  ;;  %2693 = vst [vmem:[#allocation71_spill] sm:$0xff] %v2181_v39  ;;  %v2186_v47 = vld [vmem:[%s2626_s3 + $0x300] sm:$0xff]  ;;  %v2191_v54 = vld [vmem:[%s2626_s3 + $0x308] sm:$0xff] }
  0x2c   :  { %2694 = vst [vmem:[#allocation72_spill] sm:$0xff] %v2186_v47  ;;  %2695 = vst [vmem:[#allocation73_spill] sm:$0xff] %v2191_v54  ;;  %v2196_v63 = vld [vmem:[%s2626_s3 + $0x310] sm:$0xff]  ;;  %v2201_v55 = vld [vmem:[%s2626_s3 + $0x318] sm:$0xff] }
  0x2d   :  { %2696 = vst [vmem:[#allocation74_spill] sm:$0xff] %v2196_v63  ;;  %2697 = vst [vmem:[#allocation75_spill] sm:$0xff] %v2201_v55  ;;  %v2206_v39 = vld [vmem:[%s2626_s3 + $0x320] sm:$0xff]  ;;  %v2211_v47 = vld [vmem:[%s2626_s3 + $0x328] sm:$0xff] }
  0x2e   :  { %2698 = vst [vmem:[#allocation76_spill] sm:$0xff] %v2206_v39  ;;  %2699 = vst [vmem:[#allocation77_spill] sm:$0xff] %v2211_v47  ;;  %v2216_v54 = vld [vmem:[%s2626_s3 + $0x330] sm:$0xff]  ;;  %v2221_v63 = vld [vmem:[%s2626_s3 + $0x338] sm:$0xff] }
  0x2f   :  { %2700 = vst [vmem:[#allocation78_spill] sm:$0xff] %v2216_v54  ;;  %2701 = vst [vmem:[#allocation79_spill] sm:$0xff] %v2221_v63  ;;  %v2226_v55 = vld [vmem:[%s2626_s3 + $0x340] sm:$0xff]  ;;  %v2231_v39 = vld [vmem:[%s2626_s3 + $0x348] sm:$0xff] }
  0x30   :  { %2702 = vst [vmem:[#allocation80_spill] sm:$0xff] %v2226_v55  ;;  %2703 = vst [vmem:[#allocation81_spill] sm:$0xff] %v2231_v39  ;;  %v2236_v47 = vld [vmem:[%s2626_s3 + $0x350] sm:$0xff]  ;;  %v2241_v54 = vld [vmem:[%s2626_s3 + $0x358] sm:$0xff] }
  0x31   :  { %2704 = vst [vmem:[#allocation82_spill] sm:$0xff] %v2236_v47  ;;  %2705 = vst [vmem:[#allocation83_spill] sm:$0xff] %v2241_v54  ;;  %v2246_v63 = vld [vmem:[%s2626_s3 + $0x360] sm:$0xff]  ;;  %v2251_v55 = vld [vmem:[%s2626_s3 + $0x368] sm:$0xff] }
  0x32   :  { %2706 = vst [vmem:[#allocation84_spill] sm:$0xff] %v2246_v63  ;;  %2707 = vst [vmem:[#allocation85_spill] sm:$0xff] %v2251_v55  ;;  %v2256_v39 = vld [vmem:[%s2626_s3 + $0x370] sm:$0xff]  ;;  %v2261_v47 = vld [vmem:[%s2626_s3 + $0x378] sm:$0xff] }
  0x33   :  { %2708 = vst [vmem:[#allocation86_spill] sm:$0xff] %v2256_v39  ;;  %2709 = vst [vmem:[#allocation87_spill] sm:$0xff] %v2261_v47  ;;  %v2266_v54 = vld [vmem:[%s2626_s3 + $0x380] sm:$0xff]  ;;  %v2271_v63 = vld [vmem:[%s2626_s3 + $0x388] sm:$0xff] }
  0x34   :  { %2710 = vst [vmem:[#allocation88_spill] sm:$0xff] %v2266_v54  ;;  %2711 = vst [vmem:[#allocation89_spill] sm:$0xff] %v2271_v63  ;;  %v2276_v55 = vld [vmem:[%s2626_s3 + $0x390] sm:$0xff]  ;;  %v2281_v39 = vld [vmem:[%s2626_s3 + $0x398] sm:$0xff] }
  0x35   :  { %2712 = vst [vmem:[#allocation90_spill] sm:$0xff] %v2276_v55  ;;  %2713 = vst [vmem:[#allocation91_spill] sm:$0xff] %v2281_v39  ;;  %v2286_v47 = vld [vmem:[%s2626_s3 + $0x3a0] sm:$0xff]  ;;  %v2291_v54 = vld [vmem:[%s2626_s3 + $0x3a8] sm:$0xff] }
  0x36   :  { %2714 = vst [vmem:[#allocation92_spill] sm:$0xff] %v2286_v47  ;;  %2715 = vst [vmem:[#allocation93_spill] sm:$0xff] %v2291_v54  ;;  %v2296_v63 = vld [vmem:[%s2626_s3 + $0x3b0] sm:$0xff]  ;;  %v2301_v55 = vld [vmem:[%s2626_s3 + $0x3b8] sm:$0xff] }
  0x37   :  { %2716 = vst [vmem:[#allocation94_spill] sm:$0xff] %v2296_v63  ;;  %2717 = vst [vmem:[#allocation95_spill] sm:$0xff] %v2301_v55  ;;  %v2306_v39 = vld [vmem:[%s2626_s3 + $0x3c0] sm:$0xff]  ;;  %v2311_v47 = vld [vmem:[%s2626_s3 + $0x3c8] sm:$0xff] }
  0x38   :  { %2718 = vst [vmem:[#allocation96_spill] sm:$0xff] %v2306_v39  ;;  %2719 = vst [vmem:[#allocation97_spill] sm:$0xff] %v2311_v47  ;;  %v2316_v54 = vld [vmem:[%s2626_s3 + $0x3d0] sm:$0xff]  ;;  %v2321_v63 = vld [vmem:[%s2626_s3 + $0x3d8] sm:$0xff] }
  0x39   :  { %2720 = vst [vmem:[#allocation98_spill] sm:$0xff] %v2316_v54  ;;  %2721 = vst [vmem:[#allocation99_spill] sm:$0xff] %v2321_v63  ;;  %v2326_v55 = vld [vmem:[%s2626_s3 + $0x3e0] sm:$0xff]  ;;  %v2331_v39 = vld [vmem:[%s2626_s3 + $0x3e8] sm:$0xff] }
  0x3a   :  { %2722 = vst [vmem:[#allocation100_spill] sm:$0xff] %v2326_v55  ;;  %2723 = vst [vmem:[#allocation101_spill] sm:$0xff] %v2331_v39  ;;  %v2336_v47 = vld [vmem:[%s2626_s3 + $0x3f0] sm:$0xff]  ;;  %v2341_v54 = vld [vmem:[%s2626_s3 + $0x3f8] sm:$0xff] }
  0x3b   :  { %2724 = vst [vmem:[#allocation102_spill] sm:$0xff] %v2336_v47  ;;  %2725 = vst [vmem:[#allocation103_spill] sm:$0xff] %v2341_v54  ;;  %v322_v63 = vld [vmem:[%s2623_s0] sm:$0xff]  ;;  %v324_v55 = vld [vmem:[%s2623_s0 + $0x10] sm:$0xff] }
  0x3c   :  { %v323_v39 = vld [vmem:[%s2623_s0 + $0x8] sm:$0xff]  ;;  %v327_v47 = vsel %vm326_vm0, %v322_v63, 0.0  ;;  %v333_v38 = vsel %vm326_vm0, %v324_v55, 0.0  ;;  %v325_v54 = vld [vmem:[%s2623_s0 + $0x18] sm:$0xff] }
  0x3d   :  { %321 = vsyncadd [#allocation3], 16384  ;;  %328 = vadd.xlane.f32.xlu0 %v327_v47  ;;  %334 = vadd.xlane.f32.xlu1 %v333_v38  ;;  %v330_v62 = vsel %vm326_vm0, %v323_v39, 0.0  ;;  %v336_v46 = vsel %vm326_vm0, %v325_v54, 0.0  ;;  %s1659_s15 = smov 32   ;;  %vm512_vm1 = vcmask 523264  }
  0x3e   :  { %1319 = vmatprep.subr.bf16.mxu1 %v1746_v8 }
  0x41   :  { %331 = vadd.xlane.f32.xlu0 %v330_v62  ;;  %337 = vadd.xlane.f32.xlu1 %v336_v46 }
  0xca   :  { %v329_v53 = vpop.xlane.xlu0 %328  ;;  %v335_v37 = vpop.xlane.xlu1 %334 }
  0xcb   :  { %v340_v61 = vmul.f32 0.03125, %v329_v53  ;;  %v342_v45 = vmul.f32 0.03125, %v335_v37 }
  0xcd   :  { %v344_v52 = vsub.f32 %v322_v63, %v340_v61  ;;  %v346_v36 = vsub.f32 %v324_v55, %v342_v45 }
  0xce   :  { %v332_v60 = vpop.xlane.xlu0 %331  ;;  %v338_v44 = vpop.xlane.xlu1 %337 }
  0xcf   :  { %v341_v51 = vmul.f32 0.03125, %v332_v60  ;;  %v343_v35 = vmul.f32 0.03125, %v338_v44  ;;  %v348_v59 = vmul.f32 %v344_v52, %v344_v52  ;;  %v350_v43 = vmul.f32 %v346_v36, %v346_v36  ;;  %v1585_v44 = vld [vmem:[%s2624_s1] sm:$0xff]  }
  0xd0   :  { %1549 = vmatprep.subr.bf16.mxu0 %v1585_v44 }
  0xd1   :  { %v345_v47 = vsub.f32 %v323_v39, %v341_v51  ;;  %v347_v38 = vsub.f32 %v325_v54, %v343_v35  ;;  %v352_v50 = vsel %vm326_vm0, %v348_v59, 0.0  ;;  %v358_v62 = vsel %vm326_vm0, %v350_v43, 0.0  ;;  %v1586_v35 = vld [vmem:[%s2624_s1 + $0x8] sm:$0xff]   ;;  %1550 = vmatpush3.bf16.msra.mxu0 %v1585_v44 }
  0xd2   :  { %353 = vadd.xlane.f32.xlu0 %v352_v50  ;;  %1551 = vmatprep.subr.bf16.mxu0 %v1586_v35 }
  0xd3   :  { %v349_v46 = vmul.f32 %v345_v47, %v345_v47  ;;  %v351_v34 = vmul.f32 %v347_v38, %v347_v38 }
  0xd5   :  { %v355_v53 = vsel %vm326_vm0, %v349_v46, 0.0  ;;  %v361_v37 = vsel %vm326_vm0, %v351_v34, 0.0  ;;  %1552 = vmatpush3.bf16.msra.mxu0 %v1586_v35 }
  0xd6   :  { %359 = vadd.xlane.f32.xlu0 %v358_v62  ;;  %356 = vadd.xlane.f32.xlu1 %v355_v53 }
  0xd7   :  { %1347 = vmatprep.subr.bf16.mxu0 %v1826_v24 }
  0xda   :  { %362 = vadd.xlane.f32.xlu1 %v361_v37 }
 0x15f   :  { %v354_v39 = vpop.xlane.xlu0 %353 }
 0x160   :  { %v364_v43 = vmul.f32 0.03125, %v354_v39 }
 0x162   :  { %v368_v45 = vadd.f32 1e-05, %v364_v43 }
 0x163   :  { %v357_v50 = vpop.xlane.xlu1 %356  ;;  %v360_v51 = vpop.xlane.xlu0 %359 }
 0x164   :  { %v365_v54 = vmul.f32 0.03125, %v357_v50  ;;  %v366_v34 = vmul.f32 0.03125, %v360_v51  ;;  %1587 = vrsqrt.f32 %v368_v45  ;;  %v1293_v51 = vld [vmem:[%s2625_s2] ss:$0 sm:$0xff]  ;;  %s1657_s2 = smov 64  }
 0x166   :  { %v369_v55 = vadd.f32 1e-05, %v365_v54  ;;  %v370_v59 = vadd.f32 1e-05, %v366_v34 }
 0x167   :  { %v363_v60 = vpop.xlane.xlu1 %362 }
 0x168   :  { %1589 = vrsqrt.f32 %v369_v55  ;;  %v367_v61 = vmul.f32 0.03125, %v363_v60 }
 0x169   :  { %1591 = vrsqrt.f32 %v370_v59 }
 0x16a   :  { %v371_v63 = vadd.f32 1e-05, %v367_v61 }
 0x16c   :  { %1593 = vrsqrt.f32 %v371_v63 }
 0x16e   :  { %v1588_v62 = vpop.eup %1587 }
 0x16f   :  { %v376_v53 = vmul.f32 %v1588_v62, %v344_v52 }
 0x172   :  { %v1590_v46 = vpop.eup %1589 }
 0x173   :  { %v377_v37 = vmul.f32 %v1590_v46, %v345_v47  ;;  %v1592_v44 = vpop.eup %1591 }
 0x174   :  { %v378_v43 = vmul.f32 %v1592_v44, %v346_v36 }
 0x175   :  { %v380_v35 = vpack.c.bf16 %v377_v37, %v376_v53 }
 0x176   :  { %v1594_v39 = vpop.eup %1593 }
 0x177   :  { %1553 = vmatprep.mubr.msk.bf16.mxu0 %vm326_vm0, %v380_v35  ;;  %v379_v50 = vmul.f32 %v1594_v39, %v347_v38 }
 0x179   :  { %v381_v45 = vpack.c.bf16 %v379_v50, %v378_v43 }
 0x17b   :  { %1554 = vmatmul.mubr.msk.bf16.vlgmr.msra.gmra.mrb[0].mxu0 %vm326_vm0, %v381_v45 }
 0x24e   :  { %v1555_v54 = vpop.f32.mrb[0].mxu0 }
 0x24f   :  { %v454_v34 = vadd.f32 %v1555_v54, %v1293_v51  ;;  %v445_v55 = vpop.f32.mrb[1].mxu0 }
 0x250   :  { %v446_v59 = vadd.f32 %v1293_v51, %v445_v55  ;;  %v1556_v52 = vpop.f32.mrb[2].mxu0 }
 0x251   :  { %v1300_v47 = vmul.f32 -1.442695, %v454_v34  ;;  %v457_v60 = vadd.f32 %v1556_v52, %v1293_v51  ;;  %v448_v61 = vpop.f32.mrb[3].mxu0 }
 0x252   :  { %v1298_v63 = vmul.f32 -1.442695, %v446_v59  ;;  %v449_v62 = vadd.f32 %v1293_v51, %v448_v61 }
 0x253   :  { %1595 = vpow2.f32 %v1300_v47  ;;  %v1301_v36 = vmul.f32 -1.442695, %v457_v60 }
 0x254   :  { %1597 = vpow2.f32 %v1298_v63  ;;  %v1299_v38 = vmul.f32 -1.442695, %v449_v62 }
 0x256   :  { %1599 = vpow2.f32 %v1299_v38 }
 0x257   :  { %1601 = vpow2.f32 %v1301_v36 }
 0x25d   :  { %v1596_v46 = vpop.eup %1595 }
 0x25e   :  { %v1598_v53 = vpop.eup %1597  ;;  %v474_v37 = vadd.f32 1.0, %v1596_v46 }
 0x25f   :  { %v472_v44 = vadd.f32 1.0, %v1598_v53 }
 0x260   :  { %v1600_v35 = vpop.eup %1599  ;;  %1603 = vrcp.f32 %v474_v37  ;;  %v1658_v37 = vmov 0.0  }
 0x261   :  { %v1602_v39 = vpop.eup %1601  ;;  %1605 = vrcp.f32 %v472_v44  ;;  %v473_v43 = vadd.f32 1.0, %v1600_v35 }
 0x262   :  { %v475_v50 = vadd.f32 1.0, %v1602_v39 }
 0x263   :  { %1607 = vrcp.f32 %v473_v43 }
 0x264   :  { %1609 = vrcp.f32 %v475_v50 }
 0x26a   :  { %v1604_v45 = vpop.eup %1603 }
 0x26b   :  { %v1606_v51 = vpop.eup %1605  ;;  %492 = vrot.lane.b32.xlu1 %v1604_v45, %s1657_s2 }
 0x26c   :  { %488 = vrot.lane.b32.xlu0 %v1606_v51, %s1657_s2  ;;  %v519_v51 = vlaneseq }
 0x26d   :  { %v1608_v54 = vpop.eup %1607 }
 0x26e   :  { %v1610_v55 = vpop.eup %1609 }
 0x26f   :  { %490 = vrot.lane.b32.xlu1 %v1608_v54, %s1657_s2 }
 0x273   :  { %494 = vrot.lane.b32.xlu1 %v1610_v55, %s1657_s2  ;;  %v2383_v55 = vand.u32 127, %v519_v51 }
 0x275   :  { %vm521_vm2 = vcmp.lt.s32.totalorder %v2383_v55, 32 }
 0x2dd   :  { %v493_v52 = vpop.permute.xlu1 %492 }
 0x2de   :  { %v489_v47 = vpop.permute.xlu0 %488  ;;  %v502_v38 = vmul.f32 %v493_v52, %v454_v34 }
 0x2df   :  { %v500_v61 = vmul.f32 %v489_v47, %v446_v59 }
 0x2e1   :  { %v491_v63 = vpop.permute.xlu1 %490  ;;  %506 = vrot.lane.b32.xlu0 %v500_v61, %s1657_s2 }
 0x2e2   :  { %v501_v36 = vmul.f32 %v491_v63, %v449_v62 }
 0x2e4   :  { %508 = vrot.lane.b32.xlu1 %v501_v36, %s1657_s2 }
 0x2e5   :  { %v495_v46 = vpop.permute.xlu1 %494  ;;  %564 = vrot.lane.b32.xlu0 %v502_v38, %s1657_s2 }
 0x2e6   :  { %v503_v53 = vmul.f32 %v495_v46, %v457_v60 }
 0x2e8   :  { %566 = vrot.lane.b32.xlu1 %v503_v53, %s1657_s2 }
 0x2e9   :  { %515 = vrot.lane.b32.xlu0 %v1658_v37, %s1659_s15 }
 0x353   :  { %v507_v44 = vpop.permute.xlu0 %506 }
 0x354   :  { %v513_v35 = vsel %vm512_vm1, 0.0, %v507_v44 }
 0x355   :  { %517 = vrot.lane.b32.xlu1 %v513_v35, %s1659_s15 }
 0x356   :  { %v509_v59 = vpop.permute.xlu1 %508 }
 0x357   :  { %v514_v39 = vsel %vm512_vm1, 0.0, %v509_v59  ;;  %v565_v62 = vpop.permute.xlu0 %564 }
 0x358   :  { %v570_v34 = vsel %vm512_vm1, 0.0, %v565_v62  ;;  %524 = vrot.lane.b32.xlu0 %v514_v39, %s1659_s15 }
 0x359   :  { %572 = vrot.lane.b32.xlu1 %v570_v34, %s1659_s15 }
 0x35a   :  { %v567_v60 = vpop.permute.xlu1 %566 }
 0x35b   :  { %v571_v43 = vsel %vm512_vm1, 0.0, %v567_v60  ;;  %v516_v50 = vpop.permute.xlu0 %515 }
 0x35c   :  { %576 = vrot.lane.b32.xlu0 %v571_v43, %s1659_s15  ;;  %v535_v45 = vadd.f32 %v516_v50, %v516_v50 }
 0x35e   :  { %v536_v54 = vrot.slane %v535_v45, 4 }
 0x360   :  { %v537_v52 = vadd.f32 %v536_v54, %v535_v45 }
 0x362   :  { %v538_v63 = vrot.slane %v537_v52, 2 }
 0x364   :  { %v539_v34 = vadd.f32 %v538_v63, %v537_v52 }
 0x366   :  { %v540_v63 = vrot.slane %v539_v34, 1 }
 0x368   :  { %v541_v48 = vadd.f32 %v540_v63, %v539_v34 }
 0x3c7   :  { %v518_v47 = vpop.permute.xlu1 %517 }
 0x3c8   :  { %v522_v36 = vsel %vm521_vm2, %v516_v50, %v518_v47  ;;  %v523_v38 = vsel %vm521_vm2, %v518_v47, %v516_v50 }
 0x3ca   :  { %v525_v61 = vpop.permute.xlu0 %524 }
 0x3cb   :  { %v526_v46 = vsel %vm521_vm2, %v516_v50, %v525_v61  ;;  %v527_v53 = vsel %vm521_vm2, %v525_v61, %v516_v50  ;;  %v573_v35 = vpop.permute.xlu1 %572 }
 0x3cc   :  { %v528_v37 = vadd.f32 %v527_v53, %v523_v38  ;;  %v542_v44 = vadd.f32 %v526_v46, %v522_v36  ;;  %v574_v60 = vsel %vm521_vm2, %v516_v50, %v573_v35  ;;  %v575_v43 = vsel %vm521_vm2, %v573_v35, %v516_v50 }
 0x3ce   :  { %v529_v59 = vrot.slane %v528_v37, 4  ;;  %v543_v39 = vrot.slane %v542_v44, 4  ;;  %v577_v62 = vpop.permute.xlu0 %576 }
 0x3cf   :  { %v578_v45 = vsel %vm521_vm2, %v516_v50, %v577_v62  ;;  %v579_v51 = vsel %vm521_vm2, %v577_v62, %v516_v50 }
 0x3d0   :  { %v530_v54 = vadd.f32 %v529_v59, %v528_v37  ;;  %v544_v47 = vadd.f32 %v543_v39, %v542_v44  ;;  %v580_v61 = vadd.f32 %v579_v51, %v575_v43  ;;  %v587_v36 = vadd.f32 %v578_v45, %v574_v60 }
 0x3d2   :  { %v531_v38 = vrot.slane %v530_v54, 2  ;;  %v545_v46 = vrot.slane %v544_v47, 2  ;;  %v581_v53 = vrot.slane %v580_v61, 4  ;;  %v588_v52 = vrot.slane %v587_v36, 4 }
 0x3d4   :  { %v532_v58 = vadd.f32 %v531_v38, %v530_v54  ;;  %v546_v42 = vadd.f32 %v545_v46, %v544_v47  ;;  %v582_v49 = vadd.f32 %v581_v53, %v580_v61  ;;  %v589_v33 = vadd.f32 %v588_v52, %v587_v36 }
 0x3d6   :  { %v583_v35 = vrot.slane %v582_v49, 2  ;;  %v590_v57 = vrot.slane %v589_v33, 2  ;;  %v533_v41 = vrot.slane %v532_v58, 1  ;;  %v547_v50 = vrot.slane %v546_v42, 1 }
 0x3d8   :  { %v584_v32 = vadd.f32 %v583_v35, %v582_v49  ;;  %v534_v56 = vadd.f32 %v533_v41, %v532_v58  ;;  %v591_v37 = vadd.f32 %v590_v57, %v589_v33  ;;  %v548_v62 = vadd.f32 %v547_v50, %v546_v42 }
 0x3da   :  { %v1575_v44 = vpack.i.bf16 %v541_v48, %v534_v56  ;;  %v585_v59 = vrot.slane %v584_v32, 1  ;;  %v592_v39 = vrot.slane %v591_v37, 1 }
 0x3dc   :  { %1576 = vrot.lane.b32.xlu1 %v1575_v44, %s1659_s15  ;;  %v586_v60 = vadd.f32 %v585_v59, %v584_v32  ;;  %v593_v45 = vadd.f32 %v592_v39, %v591_v37 }
 0x3de   :  { %v1580_v43 = vpack.i.bf16 %v586_v60, %v548_v62 }
 0x3e0   :  { %1581 = vrot.lane.b32.xlu0 %v1580_v43, %s1659_s15  ;;  %596 = vrot.lane.b32.xlu1 %v593_v45, %s1659_s15 }
 0x44e   :  { %v1577_v51 = vpop.permute.xlu1 %1576 }
 0x44f   :  { %v1579_v54 = vunpack.i.h.bf16 %v1577_v51  ;;  %v1578_v34 = vunpack.i.l.bf16 %v1577_v51 }
 0x451   :  { %v2405_v49 = vpack.c.bf16 %v1579_v54, %v1579_v54  ;;  %v556_v33 = vsel %vm521_vm2, %v1578_v34, %v1579_v54 }
 0x452   :  { %v559_v41 = vpack.c.bf16 %v556_v33, %v556_v33  ;;  %v1582_v48 = vpop.permute.xlu0 %1581  ;;  %v597_v56 = vpop.permute.xlu1 %596 }
 0x453   :  { %v1584_v57 = vunpack.i.h.bf16 %v1582_v48  ;;  %v1583_v42 = vunpack.i.l.bf16 %v1582_v48  ;;  %v2411_v32 = vsel %vm521_vm2, %v1579_v54, %v597_v56 }
 0x454   :  { %v603_v58 = vpack.c.bf16 %v2411_v32, %v2411_v32 }
 0x455   :  { %v599_v47 = vsel %vm521_vm2, %v1584_v57, %v1579_v54  ;;  %v2419_v61 = vsel %vm521_vm2, %v1579_v54, %v1583_v42  ;;  %v557_v36 = vsel %vm521_vm2, %v1583_v42, %v1578_v34  ;;  %v600_v38 = vsel %vm521_vm2, %v597_v56, %v1584_v57 }
 0x456   :  { %v602_v46 = vpack.c.bf16 %v599_v47, %v599_v47  ;;  %v558_v53 = vpack.c.bf16 %v557_v36, %v557_v36  ;;  %v561_v52 = vpack.c.bf16 %v2419_v61, %v2419_v61  ;;  %v601_v63 = vpack.c.bf16 %v600_v38, %v600_v38 }
 0x457   :  { %1653 = dma.done.wait [#allocation3], 16384 }
 0x458   :  { %1654 = vsyncadd [#allocation3], 4294950912  ;;  %1320 = vmatpush3.bf16.msra.mxu1 %v1706_v0  ;;  %1348 = vmatpush3.bf16.msra.mxu0 %v1786_v16  ;;  %v2726_v0 = vld [vmem:[#allocation32_spill] sm:$0xff]  ;;  %v2734_v8 = vld [vmem:[#allocation34_spill] sm:$0xff]  ;;  %s1660_s26 = smov [#allocation4]  }
 0x459   :  { %1321 = vmatprep.subr.bf16.mxu1 %v1751_v9  ;;  %1349 = vmatprep.subr.bf16.mxu0 %v1831_v25  ;;  %v2735_v9 = vld [vmem:[#allocation11_spill] sm:$0xff]  ;;  %v2742_v16 = vld [vmem:[#allocation36_spill] sm:$0xff]  ;;  %v2750_v24 = vld [vmem:[#allocation38_spill] sm:$0xff]  ;;  %s1268_s27 = sshll.u32 %s1660_s26, 4  ;;  %s1269_s27 = int_to_ptr.vmem [resolvable:$true] %s1268_s27 }
 0x45a   :  { %775 = vmatprep.mubr.bf16.mxu1 %v559_v41  ;;  %824 = vmatprep.mubr.bf16.mxu0 %v2405_v49  ;;  %v2751_v25 = vld [vmem:[#allocation15_spill] sm:$0xff]  ;;  %v2759_v55 = vld [vmem:[#allocation40_spill] sm:$0xff]  ;;  %v2761_v50 = vld [vmem:[#allocation49_spill] sm:$0xff]  ;;  %p1636_p1 = scmp.lt.s32.totalorder %s1269_s27, %s1269_s27 }
 0x45b   :  { %v2760_v35 = vld [vmem:[#allocation56_spill] sm:$0xff]  ;;  %v2762_v37 = vld [vmem:[#allocation65_spill] sm:$0xff]  ;;  %v2765_v39 = vld [vmem:[#allocation50_spill] sm:$0xff] }
 0x45c   :  { %1322 = vmatpush3.bf16.msra.mxu1 %v1711_v1  ;;  %1350 = vmatpush3.bf16.msra.mxu0 %v1791_v17  ;;  %v2727_v1 = vld [vmem:[#allocation9_spill] sm:$0xff]  ;;  %v2766_v62 = vld [vmem:[#allocation66_spill] sm:$0xff]  ;;  %v2769_v45 = vld [vmem:[#allocation51_spill] sm:$0xff] }
 0x45d   :  { %1323 = vmatprep.subr.bf16.mxu1 %v1756_v10  ;;  %1351 = vmatprep.subr.bf16.mxu0 %v1836_v26  ;;  %v2736_v10 = vld [vmem:[#allocation26_spill] sm:$0xff]  ;;  %v2743_v17 = vld [vmem:[#allocation13_spill] sm:$0xff]  ;;  %v2770_v51 = vld [vmem:[#allocation67_spill] sm:$0xff] }
 0x45e   :  { %v2752_v26 = vld [vmem:[#allocation30_spill] sm:$0xff]  ;;  %v2763_v44 = vld [vmem:[#allocation41_spill] sm:$0xff]  ;;  %v2771_v54 = vld [vmem:[#allocation43_spill] sm:$0xff] }
 0x45f   :  { %v2764_v59 = vld [vmem:[#allocation57_spill] sm:$0xff]  ;;  %v2767_v60 = vld [vmem:[#allocation42_spill] sm:$0xff]  ;;  %v2772_v34 = vld [vmem:[#allocation59_spill] sm:$0xff] }
 0x460   :  { %1324 = vmatpush3.bf16.msra.mxu1 %v1716_v2  ;;  %1352 = vmatpush3.bf16.msra.mxu0 %v1796_v18  ;;  %v2728_v2 = vld [vmem:[#allocation24_spill] sm:$0xff]  ;;  %v2768_v43 = vld [vmem:[#allocation58_spill] sm:$0xff]  ;;  %v2777_v57 = vld [vmem:[#allocation53_spill] sm:$0xff] }
 0x461   :  { %1325 = vmatprep.subr.bf16.mxu1 %v1761_v11  ;;  %1353 = vmatprep.subr.bf16.mxu0 %v1841_v27  ;;  %v2737_v11 = vld [vmem:[#allocation19_spill] sm:$0xff]  ;;  %v2744_v18 = vld [vmem:[#allocation28_spill] sm:$0xff]  ;;  %v2778_v42 = vld [vmem:[#allocation69_spill] sm:$0xff] }
 0x462   :  { %v2753_v27 = vld [vmem:[#allocation23_spill] sm:$0xff]  ;;  %v2773_v33 = vld [vmem:[#allocation52_spill] sm:$0xff]  ;;  %v2779_v47 = vld [vmem:[#allocation45_spill] sm:$0xff] }
 0x463   :  { %v2774_v41 = vld [vmem:[#allocation68_spill] sm:$0xff]  ;;  %v2780_v36 = vld [vmem:[#allocation61_spill] sm:$0xff]  ;;  %v2781_v38 = vld [vmem:[#allocation54_spill] sm:$0xff] }
 0x464   :  { %1326 = vmatpush3.bf16.msra.mxu1 %v1721_v3  ;;  %1354 = vmatpush3.bf16.msra.mxu0 %v1801_v19  ;;  %v2729_v3 = vld [vmem:[#allocation17_spill] sm:$0xff]  ;;  %v2775_v48 = vld [vmem:[#allocation44_spill] sm:$0xff] }
 0x465   :  { %1327 = vmatprep.subr.bf16.mxu1 %v1766_v12  ;;  %1355 = vmatprep.subr.bf16.mxu0 %v1846_v28  ;;  %v2738_v12 = vld [vmem:[#allocation35_spill] sm:$0xff]  ;;  %v2745_v19 = vld [vmem:[#allocation21_spill] sm:$0xff]  ;;  %v2776_v56 = vld [vmem:[#allocation60_spill] sm:$0xff] }
 0x466   :  { %v2754_v28 = vld [vmem:[#allocation39_spill] sm:$0xff]  ;;  %v2812_v61 = vld [vmem:[#allocation93_spill] sm:$0xff] }
 0x468   :  { %1328 = vmatpush3.bf16.msra.mxu1 %v1726_v4  ;;  %1356 = vmatpush3.bf16.msra.mxu0 %v1806_v20  ;;  %v2730_v4 = vld [vmem:[#allocation33_spill] sm:$0xff] }
 0x469   :  { %1329 = vmatprep.subr.bf16.mxu1 %v1771_v13  ;;  %1357 = vmatprep.subr.bf16.mxu0 %v1851_v29  ;;  %v2739_v13 = vld [vmem:[#allocation12_spill] sm:$0xff]  ;;  %v2746_v20 = vld [vmem:[#allocation37_spill] sm:$0xff] }
 0x46a   :  { %v2755_v29 = vld [vmem:[#allocation16_spill] sm:$0xff] }
 0x46c   :  { %1330 = vmatpush3.bf16.msra.mxu1 %v1731_v5  ;;  %1358 = vmatpush3.bf16.msra.mxu0 %v1811_v21  ;;  %v2731_v5 = vld [vmem:[#allocation10_spill] sm:$0xff] }
 0x46d   :  { %1331 = vmatprep.subr.bf16.mxu1 %v1776_v14  ;;  %1359 = vmatprep.subr.bf16.mxu0 %v1856_v30  ;;  %v2740_v14 = vld [vmem:[#allocation27_spill] sm:$0xff]  ;;  %v2747_v21 = vld [vmem:[#allocation14_spill] sm:$0xff] }
 0x46e   :  { %v2756_v30 = vld [vmem:[#allocation31_spill] sm:$0xff] }
 0x470   :  { %1332 = vmatpush3.bf16.msra.mxu1 %v1736_v6  ;;  %1360 = vmatpush3.bf16.msra.mxu0 %v1816_v22  ;;  %v2732_v6 = vld [vmem:[#allocation25_spill] sm:$0xff] }
 0x471   :  { %1333 = vmatprep.subr.bf16.mxu1 %v1781_v15  ;;  %1361 = vmatprep.subr.bf16.mxu0 %v1861_v31  ;;  %v2741_v15 = vld [vmem:[#allocation20_spill] sm:$0xff]  ;;  %v2748_v22 = vld [vmem:[#allocation29_spill] sm:$0xff] }
 0x472   :  { %v2757_v31 = vld [vmem:[#allocation48_spill] sm:$0xff] }
 0x474   :  { %1334 = vmatpush3.bf16.msra.mxu1 %v1741_v7  ;;  %1362 = vmatpush3.bf16.msra.mxu0 %v1821_v23  ;;  %v2733_v7 = vld [vmem:[#allocation18_spill] sm:$0xff] }
 0x475   :  { %1375 = vmatprep.subr.bf16.mxu1 %v1906_v40  ;;  %1403 = vmatprep.subr.bf16.mxu0 %v2726_v0  ;;  %v2749_v23 = vld [vmem:[#allocation22_spill] sm:$0xff]  ;;  %v2758_v40 = vld [vmem:[#allocation64_spill] sm:$0xff]  ;;  %v2785_v0 = vld [vmem:[#allocation55_spill] sm:$0xff] }
 0x477   :  { %776 = vmatmul.mubr.bf16.vlgmr.msra.gmra.mrb[0].mxu1 %v558_v53  ;;  %825 = vmatmul.mubr.bf16.vlgmr.msra.gmra.mrb[4].mxu0 %v2405_v49  ;;  %v2783_v53 = vld [vmem:[#allocation46_spill] sm:$0xff] }
 0x478   :  { %1376 = vmatpush3.bf16.msra.mxu1 %v2727_v1  ;;  %1404 = vmatpush3.bf16.msra.mxu0 %v2728_v2  ;;  %v2786_v1 = vld [vmem:[#allocation71_spill] sm:$0xff] }
 0x479   :  { %1377 = vmatprep.subr.bf16.mxu1 %v2729_v3  ;;  %1405 = vmatprep.subr.bf16.mxu0 %v2730_v4  ;;  %v2787_v2 = vld [vmem:[#allocation47_spill] sm:$0xff]  ;;  %v2789_v4 = vld [vmem:[#allocation80_spill] sm:$0xff] }
 0x47a   :  { %783 = vmatprep.mubr.bf16.mxu1 %v602_v46  ;;  %832 = vmatprep.mubr.bf16.mxu0 %v2405_v49  ;;  %v2782_v46 = vld [vmem:[#allocation70_spill] sm:$0xff]  ;;  %v2788_v3 = vld [vmem:[#allocation63_spill] sm:$0xff] }
 0x47c   :  { %1378 = vmatpush3.bf16.msra.mxu1 %v2731_v5  ;;  %1406 = vmatpush3.bf16.msra.mxu0 %v2732_v6  ;;  %v2790_v5 = vld [vmem:[#allocation96_spill] sm:$0xff] }
 0x47d   :  { %1379 = vmatprep.subr.bf16.mxu1 %v2733_v7  ;;  %1407 = vmatprep.subr.bf16.mxu0 %v2734_v8  ;;  %v2791_v6 = vld [vmem:[#allocation72_spill] sm:$0xff]  ;;  %v2793_v8 = vld [vmem:[#allocation81_spill] sm:$0xff] }
 0x47e   :  { %v2792_v7 = vld [vmem:[#allocation88_spill] sm:$0xff] }
 0x47f   :  { %784 = vmatmul.mubr.bf16.gmra.mrb[4].mxu1 %v601_v63  ;;  %833 = vmatmul.mubr.bf16.gmra.mrb[8].mxu0 %v2405_v49  ;;  %v2784_v63 = vld [vmem:[#allocation62_spill] sm:$0xff] }
 0x480   :  { %1380 = vmatpush3.bf16.msra.mxu1 %v2735_v9  ;;  %1408 = vmatpush3.bf16.msra.mxu0 %v2736_v10  ;;  %v2794_v9 = vld [vmem:[#allocation97_spill] sm:$0xff] }
 0x481   :  { %1381 = vmatprep.subr.bf16.mxu1 %v2737_v11  ;;  %1409 = vmatprep.subr.bf16.mxu0 %v2738_v12  ;;  %v2795_v10 = vld [vmem:[#allocation73_spill] sm:$0xff]  ;;  %v2797_v12 = vld [vmem:[#allocation82_spill] sm:$0xff] }
 0x482   :  { %873 = vmatprep.mubr.bf16.mxu1 %v2405_v49  ;;  %922 = vmatprep.mubr.bf16.mxu0 %v2405_v49  ;;  %v2796_v11 = vld [vmem:[#allocation89_spill] sm:$0xff] }
 0x484   :  { %1382 = vmatpush3.bf16.msra.mxu1 %v2739_v13  ;;  %1410 = vmatpush3.bf16.msra.mxu0 %v2740_v14  ;;  %v2798_v13 = vld [vmem:[#allocation98_spill] sm:$0xff] }
 0x485   :  { %1383 = vmatprep.subr.bf16.mxu1 %v2741_v15  ;;  %1411 = vmatprep.subr.bf16.mxu0 %v2742_v16  ;;  %v2799_v14 = vld [vmem:[#allocation74_spill] sm:$0xff]  ;;  %v2801_v16 = vld [vmem:[#allocation83_spill] sm:$0xff] }
 0x486   :  { %v2800_v15 = vld [vmem:[#allocation90_spill] sm:$0xff] }
 0x488   :  { %1384 = vmatpush3.bf16.msra.mxu1 %v2743_v17  ;;  %1412 = vmatpush3.bf16.msra.mxu0 %v2744_v18  ;;  %v2802_v17 = vld [vmem:[#allocation99_spill] sm:$0xff] }
 0x489   :  { %1385 = vmatprep.subr.bf16.mxu1 %v2745_v19  ;;  %1413 = vmatprep.subr.bf16.mxu0 %v2746_v20  ;;  %v2803_v18 = vld [vmem:[#allocation75_spill] sm:$0xff]  ;;  %v2805_v20 = vld [vmem:[#allocation84_spill] sm:$0xff] }
 0x48a   :  { %v2804_v19 = vld [vmem:[#allocation91_spill] sm:$0xff] }
 0x48c   :  { %1386 = vmatpush3.bf16.msra.mxu1 %v2747_v21  ;;  %1414 = vmatpush3.bf16.msra.mxu0 %v2748_v22  ;;  %v2806_v21 = vld [vmem:[#allocation100_spill] sm:$0xff] }
 0x48d   :  { %1387 = vmatprep.subr.bf16.mxu1 %v2749_v23  ;;  %1415 = vmatprep.subr.bf16.mxu0 %v2750_v24  ;;  %v2807_v22 = vld [vmem:[#allocation76_spill] sm:$0xff]  ;;  %v2809_v24 = vld [vmem:[#allocation85_spill] sm:$0xff] }
 0x48e   :  { %v2808_v23 = vld [vmem:[#allocation92_spill] sm:$0xff] }
 0x490   :  { %1388 = vmatpush3.bf16.msra.mxu1 %v2751_v25  ;;  %1416 = vmatpush3.bf16.msra.mxu0 %v2752_v26  ;;  %v2810_v25 = vld [vmem:[#allocation101_spill] sm:$0xff] }
 0x491   :  { %1389 = vmatprep.subr.bf16.mxu1 %v2753_v27  ;;  %1417 = vmatprep.subr.bf16.mxu0 %v2754_v28  ;;  %v2811_v26 = vld [vmem:[#allocation77_spill] sm:$0xff]  ;;  %v2814_v27 = vld [vmem:[#allocation102_spill] sm:$0xff] }
 0x492   :  { %v2815_v28 = vld [vmem:[#allocation78_spill] sm:$0xff] }
 0x494   :  { %1390 = vmatpush3.bf16.msra.mxu1 %v2755_v29  ;;  %1418 = vmatpush3.bf16.msra.mxu0 %v2756_v30  ;;  %v2816_v29 = vld [vmem:[#allocation94_spill] sm:$0xff]  ;;  %v2817_v30 = vld [vmem:[#allocation87_spill] sm:$0xff] }
 0x495   :  { %1431 = vmatprep.subr.bf16.mxu1 %v2757_v31  ;;  %1459 = vmatprep.subr.bf16.mxu0 %v2758_v40  ;;  %v2818_v31 = vld [vmem:[#allocation103_spill] sm:$0xff] }
 0x496   :  { %v2819_v40 = vld [vmem:[#allocation79_spill] sm:$0xff] }
 0x497   :  { %874 = vmatmul.mubr.bf16.vlgmr.msra.gmra.mrb[8].mxu1 %v2405_v49  ;;  %923 = vmatmul.mubr.bf16.vlgmr.msra.gmra.mrb[12].mxu0 %v2405_v49 }
 0x498   :  { %1432 = vmatpush3.bf16.msra.mxu1 %v2759_v55  ;;  %1460 = vmatpush3.bf16.msra.mxu0 %v2760_v35  ;;  %v2820_v55 = vld [vmem:[#allocation95_spill] sm:$0xff]  ;;  %v1611_v35 = vld [vmem:[%s2628_s5] sm:$0xff]  }
 0x499   :  { %1433 = vmatprep.subr.bf16.mxu1 %v2761_v50  ;;  %1461 = vmatprep.subr.bf16.mxu0 %v2762_v37 }
 0x49a   :  { %881 = vmatprep.mubr.bf16.mxu1 %v2405_v49  ;;  %930 = vmatprep.mubr.bf16.mxu0 %v2405_v49 }
 0x49c   :  { %1434 = vmatpush3.bf16.msra.mxu1 %v2763_v44  ;;  %1462 = vmatpush3.bf16.msra.mxu0 %v2764_v59  ;;  %v1302_v44 = vld [vmem:[%s2627_s4] ss:$0 sm:$0xff] }
 0x49d   :  { %1435 = vmatprep.subr.bf16.mxu1 %v2765_v39  ;;  %1463 = vmatprep.subr.bf16.mxu0 %v2766_v62 }
 0x49f   :  { %882 = vmatmul.mubr.bf16.gmra.mrb[12].mxu1 %v2405_v49  ;;  %931 = vmatmul.mubr.bf16.gmra.mrb[16].mxu0 %v2405_v49 }
 0x4a0   :  { %1436 = vmatpush3.bf16.msra.mxu1 %v2767_v60  ;;  %1464 = vmatpush3.bf16.msra.mxu0 %v2768_v43 }
 0x4a1   :  { %1437 = vmatprep.subr.bf16.mxu1 %v2769_v45  ;;  %1465 = vmatprep.subr.bf16.mxu0 %v2770_v51 }
 0x4a2   :  { %971 = vmatprep.mubr.bf16.mxu1 %v2405_v49  ;;  %1020 = vmatprep.mubr.bf16.mxu0 %v2405_v49 }
 0x4a4   :  { %1438 = vmatpush3.bf16.msra.mxu1 %v2771_v54  ;;  %1466 = vmatpush3.bf16.msra.mxu0 %v2772_v34 }
 0x4a5   :  { %1439 = vmatprep.subr.bf16.mxu1 %v2773_v33  ;;  %1467 = vmatprep.subr.bf16.mxu0 %v2774_v41 }
 0x4a8   :  { %1440 = vmatpush3.bf16.msra.mxu1 %v2775_v48  ;;  %1468 = vmatpush3.bf16.msra.mxu0 %v2776_v56  ;;  %v1613_v48 = vld [vmem:[%s2628_s5 + $0x10] sm:$0xff]  }
 0x4a9   :  { %1441 = vmatprep.subr.bf16.mxu1 %v2777_v57  ;;  %1469 = vmatprep.subr.bf16.mxu0 %v2778_v42 }
 0x4ac   :  { %1442 = vmatpush3.bf16.msra.mxu1 %v2779_v47  ;;  %1470 = vmatpush3.bf16.msra.mxu0 %v2780_v36 }
 0x4ad   :  { %1443 = vmatprep.subr.bf16.mxu1 %v2781_v38  ;;  %1471 = vmatprep.subr.bf16.mxu0 %v2782_v46 }
 0x4b0   :  { %1444 = vmatpush3.bf16.msra.mxu1 %v2783_v53  ;;  %1472 = vmatpush3.bf16.msra.mxu0 %v2784_v63 }
 0x4b1   :  { %1445 = vmatprep.subr.bf16.mxu1 %v2785_v0  ;;  %1473 = vmatprep.subr.bf16.mxu0 %v2786_v1  ;;  %v1614_v0 = vld [vmem:[%s2628_s5 + $0x18] sm:$0xff]  }
 0x4b4   :  { %1446 = vmatpush3.bf16.msra.mxu1 %v2787_v2  ;;  %1474 = vmatpush3.bf16.msra.mxu0 %v2788_v3 }
 0x4b5   :  { %1487 = vmatprep.subr.bf16.mxu1 %v2789_v4  ;;  %1515 = vmatprep.subr.bf16.mxu0 %v2790_v5 }
 0x4b7   :  { %972 = vmatmul.mubr.bf16.vlgmr.msra.gmra.mrb[16].mxu1 %v2405_v49  ;;  %1021 = vmatmul.mubr.bf16.vlgmr.msra.gmra.mrb[20].mxu0 %v2405_v49 }
 0x4b8   :  { %1488 = vmatpush3.bf16.msra.mxu1 %v2791_v6  ;;  %1516 = vmatpush3.bf16.msra.mxu0 %v2792_v7 }
 0x4b9   :  { %1489 = vmatprep.subr.bf16.mxu1 %v2793_v8  ;;  %1517 = vmatprep.subr.bf16.mxu0 %v2794_v9 }
 0x4ba   :  { %979 = vmatprep.mubr.bf16.mxu1 %v2405_v49  ;;  %1028 = vmatprep.mubr.bf16.mxu0 %v2405_v49 }
 0x4bc   :  { %1490 = vmatpush3.bf16.msra.mxu1 %v2795_v10  ;;  %1518 = vmatpush3.bf16.msra.mxu0 %v2796_v11 }
 0x4bd   :  { %1491 = vmatprep.subr.bf16.mxu1 %v2797_v12  ;;  %1519 = vmatprep.subr.bf16.mxu0 %v2798_v13 }
 0x4bf   :  { %980 = vmatmul.mubr.bf16.gmra.mrb[20].mxu1 %v2405_v49  ;;  %1029 = vmatmul.mubr.bf16.gmra.mrb[24].mxu0 %v2405_v49 }
 0x4c0   :  { %1492 = vmatpush3.bf16.msra.mxu1 %v2799_v14  ;;  %1520 = vmatpush3.bf16.msra.mxu0 %v2800_v15 }
 0x4c1   :  { %1493 = vmatprep.subr.bf16.mxu1 %v2801_v16  ;;  %1521 = vmatprep.subr.bf16.mxu0 %v2802_v17 }
 0x4c2   :  { %1069 = vmatprep.mubr.bf16.mxu1 %v2405_v49  ;;  %1118 = vmatprep.mubr.bf16.mxu0 %v561_v52  ;;  %v2813_v52 = vld [vmem:[#allocation86_spill] sm:$0xff] }
 0x4c4   :  { %1494 = vmatpush3.bf16.msra.mxu1 %v2803_v18  ;;  %1522 = vmatpush3.bf16.msra.mxu0 %v2804_v19 }
 0x4c5   :  { %1495 = vmatprep.subr.bf16.mxu1 %v2805_v20  ;;  %1523 = vmatprep.subr.bf16.mxu0 %v2806_v21 }
 0x4c8   :  { %1496 = vmatpush3.bf16.msra.mxu1 %v2807_v22  ;;  %1524 = vmatpush3.bf16.msra.mxu0 %v2808_v23 }
 0x4c9   :  { %1497 = vmatprep.subr.bf16.mxu1 %v2809_v24  ;;  %1525 = vmatprep.subr.bf16.mxu0 %v2810_v25 }
 0x4cc   :  { %1498 = vmatpush3.bf16.msra.mxu1 %v2811_v26  ;;  %1526 = vmatpush3.bf16.msra.mxu0 %v2812_v61 }
 0x4cd   :  { %1499 = vmatprep.subr.bf16.mxu1 %v2813_v52  ;;  %1527 = vmatprep.subr.bf16.mxu0 %v2814_v27 }
 0x4d0   :  { %1500 = vmatpush3.bf16.msra.mxu1 %v2815_v28  ;;  %1528 = vmatpush3.bf16.msra.mxu0 %v2816_v29 }
 0x4d1   :  { %1501 = vmatprep.subr.bf16.mxu1 %v2817_v30  ;;  %1529 = vmatprep.subr.bf16.mxu0 %v2818_v31 }
 0x4d4   :  { %1502 = vmatpush3.bf16.msra.mxu1 %v2819_v40  ;;  %1530 = vmatpush3.bf16.msra.mxu0 %v2820_v55 }
 0x4d5   :  { %1557 = vmatprep.subr.bf16.mxu1 %v1611_v35 }
 0x4d7   :  { %1070 = vmatmul.mubr.bf16.vlgmr.msra.gmra.mrb[24].mxu1 %v2405_v49  ;;  %1119 = vmatmul.mubr.bf16.vlgmr.msra.gmra.mrb[28].mxu0 %v2405_v49 }
 0x4d8   :  { %1077 = vmatprep.mubr.bf16.mxu1 %v2405_v49  ;;  %1126 = vmatprep.mubr.bf16.mxu0 %v603_v58 }
 0x4d9   :  { %1558 = vmatpush3.bf16.msra.mxu1 %v1611_v35 }
 0x4df   :  { %1078 = vmatmul.mubr.bf16.gmra.mrb[28].mxu1 %v2405_v49  ;;  %1127 = vmatmul.mubr.bf16.gmra.mrb[32].mxu0 %v2405_v49  ;;  %v1612_v49 = vld [vmem:[%s2628_s5 + $0x8] sm:$0xff]  }
 0x4e0   :  { %1559 = vmatprep.subr.bf16.mxu1 %v1612_v49 }
 0x4e1   :  { %1560 = vmatpush3.bf16.msra.mxu1 %v1612_v49 }
 0x4e2   :  { %1561 = vmatprep.subr.bf16.mxu1 %v1613_v48 }
 0x4e5   :  { %1562 = vmatpush3.bf16.msra.mxu1 %v1613_v48 }
 0x4e6   :  { %1563 = vmatprep.subr.bf16.mxu1 %v1614_v0 }
 0x4e9   :  { %1564 = vmatpush3.bf16.msra.mxu1 %v1614_v0 }
 0x54a   :  { %v1335_v50 = vpop.f32.mrb[0].mxu1  ;;  %v1363_v37 = vpop.f32.mrb[4].mxu0 }
 0x54b   :  { %v1336_v59 = vpop.f32.mrb[1].mxu1  ;;  %v1364_v39 = vpop.f32.mrb[5].mxu0 }
 0x54c   :  { %v1337_v32 = vadd.f32 %v1336_v59, %v1335_v50  ;;  %v1365_v58 = vadd.f32 %v1364_v39, %v1363_v37  ;;  %v1338_v62 = vpop.f32.mrb[2].mxu1  ;;  %v1366_v60 = vpop.f32.mrb[6].mxu0 }
 0x54d   :  { %v1339_v43 = vpop.f32.mrb[3].mxu1  ;;  %v1367_v45 = vpop.f32.mrb[7].mxu0 }
 0x54e   :  { %v778_v51 = vadd.f32 %v1337_v32, %v1302_v44  ;;  %v1340_v54 = vadd.f32 %v1339_v43, %v1338_v62  ;;  %v1368_v34 = vadd.f32 %v1367_v45, %v1366_v60 }
 0x550   :  { %v827_v33 = vadd.f32 %v1365_v58, %v778_v51  ;;  %v781_v41 = vadd.f32 %v1340_v54, %v1302_v44 }
 0x552   :  { %v830_v56 = vadd.f32 %v1368_v34, %v781_v41  ;;  %v1341_v57 = vpop.f32.mrb[4].mxu1  ;;  %v1369_v42 = vpop.f32.mrb[8].mxu0 }
 0x553   :  { %v1342_v47 = vpop.f32.mrb[5].mxu1  ;;  %v1370_v36 = vpop.f32.mrb[9].mxu0 }
 0x554   :  { %v1343_v38 = vadd.f32 %v1342_v47, %v1341_v57  ;;  %v1344_v46 = vpop.f32.mrb[6].mxu1  ;;  %v1371_v53 = vadd.f32 %v1370_v36, %v1369_v42  ;;  %v1372_v63 = vpop.f32.mrb[10].mxu0 }
 0x555   :  { %v1345_v1 = vpop.f32.mrb[7].mxu1  ;;  %v1373_v2 = vpop.f32.mrb[11].mxu0 }
 0x556   :  { %v786_v3 = vadd.f32 %v1343_v38, %v1302_v44  ;;  %v1346_v4 = vadd.f32 %v1345_v1, %v1344_v46  ;;  %v1374_v5 = vadd.f32 %v1373_v2, %v1372_v63 }
 0x558   :  { %v789_v6 = vadd.f32 %v1346_v4, %v1302_v44  ;;  %v835_v7 = vadd.f32 %v1371_v53, %v786_v3 }
 0x55a   :  { %v838_v8 = vadd.f32 %v1374_v5, %v789_v6 }
 0x56a   :  { %v1391_v9 = vpop.f32.mrb[8].mxu1  ;;  %v1419_v10 = vpop.f32.mrb[12].mxu0 }
 0x56b   :  { %v1392_v11 = vpop.f32.mrb[9].mxu1  ;;  %v1420_v12 = vpop.f32.mrb[13].mxu0 }
 0x56c   :  { %v1393_v13 = vadd.f32 %v1392_v11, %v1391_v9  ;;  %v1421_v14 = vadd.f32 %v1420_v12, %v1419_v10  ;;  %v1394_v15 = vpop.f32.mrb[10].mxu1  ;;  %v1422_v16 = vpop.f32.mrb[14].mxu0 }
 0x56d   :  { %v1395_v17 = vpop.f32.mrb[11].mxu1  ;;  %v1423_v18 = vpop.f32.mrb[15].mxu0 }
 0x56e   :  { %v876_v19 = vadd.f32 %v1393_v13, %v827_v33  ;;  %v1396_v20 = vadd.f32 %v1395_v17, %v1394_v15  ;;  %v1424_v21 = vadd.f32 %v1423_v18, %v1422_v16 }
 0x570   :  { %v925_v22 = vadd.f32 %v1421_v14, %v876_v19  ;;  %v879_v23 = vadd.f32 %v1396_v20, %v830_v56 }
 0x572   :  { %v928_v24 = vadd.f32 %v1424_v21, %v879_v23  ;;  %v1397_v25 = vpop.f32.mrb[12].mxu1  ;;  %v1425_v26 = vpop.f32.mrb[16].mxu0 }
 0x573   :  { %v1398_v61 = vpop.f32.mrb[13].mxu1  ;;  %v1426_v52 = vpop.f32.mrb[17].mxu0 }
 0x574   :  { %v1399_v27 = vadd.f32 %v1398_v61, %v1397_v25  ;;  %v1400_v28 = vpop.f32.mrb[14].mxu1  ;;  %v1427_v29 = vadd.f32 %v1426_v52, %v1425_v26  ;;  %v1428_v30 = vpop.f32.mrb[18].mxu0 }
 0x575   :  { %v1401_v31 = vpop.f32.mrb[15].mxu1  ;;  %v1429_v40 = vpop.f32.mrb[19].mxu0 }
 0x576   :  { %v884_v55 = vadd.f32 %v1399_v27, %v835_v7  ;;  %v1402_v35 = vadd.f32 %v1401_v31, %v1400_v28  ;;  %v1430_v50 = vadd.f32 %v1429_v40, %v1428_v30 }
 0x578   :  { %v887_v37 = vadd.f32 %v1402_v35, %v838_v8  ;;  %v933_v44 = vadd.f32 %v1427_v29, %v884_v55 }
 0x57a   :  { %v936_v59 = vadd.f32 %v1430_v50, %v887_v37 }
 0x58a   :  { %v1447_v39 = vpop.f32.mrb[16].mxu1  ;;  %v1475_v32 = vpop.f32.mrb[20].mxu0 }
 0x58b   :  { %v1448_v58 = vpop.f32.mrb[17].mxu1  ;;  %v1476_v62 = vpop.f32.mrb[21].mxu0 }
 0x58c   :  { %v1449_v60 = vadd.f32 %v1448_v58, %v1447_v39  ;;  %v1477_v49 = vadd.f32 %v1476_v62, %v1475_v32  ;;  %v1450_v43 = vpop.f32.mrb[18].mxu1  ;;  %v1478_v45 = vpop.f32.mrb[22].mxu0 }
 0x58d   :  { %v1451_v51 = vpop.f32.mrb[19].mxu1  ;;  %v1479_v54 = vpop.f32.mrb[23].mxu0 }
 0x58e   :  { %v974_v34 = vadd.f32 %v1449_v60, %v925_v22  ;;  %v1452_v33 = vadd.f32 %v1451_v51, %v1450_v43  ;;  %v1480_v41 = vadd.f32 %v1479_v54, %v1478_v45 }
 0x590   :  { %v1023_v48 = vadd.f32 %v1477_v49, %v974_v34  ;;  %v977_v56 = vadd.f32 %v1452_v33, %v928_v24 }
 0x592   :  { %v1026_v57 = vadd.f32 %v1480_v41, %v977_v56  ;;  %v1453_v42 = vpop.f32.mrb[20].mxu1  ;;  %v1481_v47 = vpop.f32.mrb[24].mxu0 }
 0x593   :  { %v1454_v36 = vpop.f32.mrb[21].mxu1  ;;  %v1482_v38 = vpop.f32.mrb[25].mxu0 }
 0x594   :  { %v1455_v46 = vadd.f32 %v1454_v36, %v1453_v42  ;;  %v1456_v53 = vpop.f32.mrb[22].mxu1  ;;  %v1483_v63 = vadd.f32 %v1482_v38, %v1481_v47  ;;  %v1484_v0 = vpop.f32.mrb[26].mxu0 }
 0x595   :  { %v1457_v1 = vpop.f32.mrb[23].mxu1  ;;  %v1485_v2 = vpop.f32.mrb[27].mxu0 }
 0x596   :  { %v982_v3 = vadd.f32 %v1455_v46, %v933_v44  ;;  %v1458_v4 = vadd.f32 %v1457_v1, %v1456_v53  ;;  %v1486_v5 = vadd.f32 %v1485_v2, %v1484_v0 }
 0x598   :  { %v985_v6 = vadd.f32 %v1458_v4, %v936_v59  ;;  %v1031_v7 = vadd.f32 %v1483_v63, %v982_v3  ;;  %v1307_v63 = vld [vmem:[%s2629_s6] ss:$0 sm:$0xff]  ;;  %s1631_s6 = scalar_lea.vmem %s1269_s27, 512 }
 0x599   :  { %p1632_p0 = scmp.ne.s32.totalorder %s1269_s27, %s1631_s6  ;;  %p1637_p2 = scmp.lt.s32.totalorder %s1631_s6, %s1631_s6 }
 0x59a   :  { %v1034_v8 = vadd.f32 %v1486_v5, %v985_v6 }
 0x59b   :  { %p1638_p3 = por %p1637_p2, %p1636_p1 }
 0x59d   :  { %p1639_p4 = pnand %p1638_p3, %p1632_p0 }
 0x5aa   :  { %v1503_v9 = vpop.f32.mrb[24].mxu1  ;;  %v1531_v10 = vpop.f32.mrb[28].mxu0 }
 0x5ab   :  { %v1504_v11 = vpop.f32.mrb[25].mxu1  ;;  %v1532_v12 = vpop.f32.mrb[29].mxu0 }
 0x5ac   :  { %v1505_v13 = vadd.f32 %v1504_v11, %v1503_v9  ;;  %v1533_v14 = vadd.f32 %v1532_v12, %v1531_v10  ;;  %v1506_v15 = vpop.f32.mrb[26].mxu1  ;;  %v1534_v16 = vpop.f32.mrb[30].mxu0 }
 0x5ad   :  { %v1507_v17 = vpop.f32.mrb[27].mxu1  ;;  %v1535_v18 = vpop.f32.mrb[31].mxu0 }
 0x5ae   :  { %v1072_v19 = vadd.f32 %v1505_v13, %v1023_v48  ;;  %v1508_v20 = vadd.f32 %v1507_v17, %v1506_v15  ;;  %v1536_v21 = vadd.f32 %v1535_v18, %v1534_v16 }
 0x5b0   :  { %v1121_v22 = vadd.f32 %v1533_v14, %v1072_v19  ;;  %v1075_v23 = vadd.f32 %v1508_v20, %v1026_v57 }
 0x5b2   :  { %v1303_v24 = vmul.f32 -1.442695, %v1121_v22  ;;  %v1124_v25 = vadd.f32 %v1536_v21, %v1075_v23  ;;  %v1509_v26 = vpop.f32.mrb[28].mxu1  ;;  %v1537_v61 = vpop.f32.mrb[32].mxu0 }
 0x5b3   :  { %v1510_v52 = vpop.f32.mrb[29].mxu1  ;;  %v1538_v27 = vpop.f32.mrb[33].mxu0 }
 0x5b4   :  { %1615 = vpow2.f32 %v1303_v24  ;;  %v1304_v28 = vmul.f32 -1.442695, %v1124_v25  ;;  %v1511_v29 = vadd.f32 %v1510_v52, %v1509_v26  ;;  %v1539_v30 = vadd.f32 %v1538_v27, %v1537_v61  ;;  %v1512_v31 = vpop.f32.mrb[30].mxu1  ;;  %v1540_v40 = vpop.f32.mrb[34].mxu0 }
 0x5b5   :  { %v1513_v55 = vpop.f32.mrb[31].mxu1  ;;  %v1541_v35 = vpop.f32.mrb[35].mxu0 }
 0x5b6   :  { %1617 = vpow2.f32 %v1304_v28  ;;  %v1080_v50 = vadd.f32 %v1511_v29, %v1031_v7  ;;  %v1514_v37 = vadd.f32 %v1513_v55, %v1512_v31  ;;  %v1542_v44 = vadd.f32 %v1541_v35, %v1540_v40 }
 0x5b8   :  { %v1129_v59 = vadd.f32 %v1539_v30, %v1080_v50  ;;  %v1083_v39 = vadd.f32 %v1514_v37, %v1034_v8 }
 0x5ba   :  { %v1305_v32 = vmul.f32 -1.442695, %v1129_v59  ;;  %v1132_v58 = vadd.f32 %v1542_v44, %v1083_v39 }
 0x5bc   :  { %1619 = vpow2.f32 %v1305_v32  ;;  %v1306_v62 = vmul.f32 -1.442695, %v1132_v58 }
 0x5be   :  { %v1616_v60 = vpop.eup %1615  ;;  %1621 = vpow2.f32 %v1306_v62 }
 0x5bf   :  { %v1147_v49 = vadd.f32 1.0, %v1616_v60 }
 0x5c0   :  { %v1618_v43 = vpop.eup %1617 }
 0x5c1   :  { %1623 = vrcp.f32 %v1147_v49  ;;  %v1148_v45 = vadd.f32 1.0, %v1618_v43 }
 0x5c3   :  { %1625 = vrcp.f32 %v1148_v45 }
 0x5c6   :  { %v1620_v51 = vpop.eup %1619 }
 0x5c7   :  { %v1149_v54 = vadd.f32 1.0, %v1620_v51 }
 0x5c8   :  { %v1622_v34 = vpop.eup %1621 }
 0x5c9   :  { %1627 = vrcp.f32 %v1149_v54  ;;  %v1150_v33 = vadd.f32 1.0, %v1622_v34 }
 0x5cb   :  { %v1624_v41 = vpop.eup %1623  ;;  %1629 = vrcp.f32 %v1150_v33 }
 0x5cc   :  { %v1159_v56 = vmul.f32 %v1624_v41, %v1121_v22 }
 0x5cd   :  { %v1626_v48 = vpop.eup %1625 }
 0x5ce   :  { %v1160_v57 = vmul.f32 %v1626_v48, %v1124_v25 }
 0x5d0   :  { %v1163_v42 = vpack.c.bf16 %v1160_v57, %v1159_v56 }
 0x5d2   :  { %1565 = vmatprep.mubr.msk.bf16.mxu1 %vm512_vm1, %v1163_v42 }
 0x5d3   :  { %v1628_v47 = vpop.eup %1627 }
 0x5d4   :  { %v1161_v38 = vmul.f32 %v1628_v47, %v1129_v59 }
 0x5d5   :  { %v1630_v36 = vpop.eup %1629 }
 0x5d6   :  { %v1162_v46 = vmul.f32 %v1630_v36, %v1132_v58 }
 0x5d8   :  { %v1164_v53 = vpack.c.bf16 %v1162_v46, %v1161_v38 }
 0x5da   :  { %1566 = vmatmul.mubr.msk.bf16.vlgmr.msra.gmra.mrb[32].mxu1 %vm512_vm1, %v1164_v53 }
 0x6ad   :  { %v1567_v0 = vpop.f32.mrb[32].mxu1 }
 0x6ae   :  { %v1253_v1 = vadd.f32 %v1567_v0, %v1307_v63  ;;  %v1244_v2 = vpop.f32.mrb[33].mxu1 }
 0x6af   :  { %v1245_v3 = vadd.f32 %v1307_v63, %v1244_v2  ;;  %v1568_v4 = vpop.f32.mrb[34].mxu1 }
 0x6b0   :  { %1261 = vst.msk [vmem:[#allocation4 + $0x10] sm:$0xff] %vm326_vm0, %v1253_v1  ;;  %v1256_v5 = vadd.f32 %v1568_v4, %v1307_v63  ;;  %v1247_v6 = vpop.f32.mrb[35].mxu1 }
 0x6b1   :  { %1259 = vst.msk [vmem:[#allocation4] sm:$0xff] %vm326_vm0, %v1245_v3  ;;  %v1248_v7 = vadd.f32 %v1307_v63, %v1247_v6 }
 0x6b2   :  { %1262 = vst.msk [vmem:[#allocation4 + $0x18] sm:$0xff] %vm326_vm0, %v1256_v5 }
 0x6b3   :  { %1260 = vst.msk [vmem:[#allocation4 + $0x8] sm:$0xff] %vm326_vm0, %v1248_v7 }
 0x6b4   :  { %1642 = shalt.err (!%p1639_p4)
}
 0x6b5   :  { %s1643_s30 = scalar_lea.hbm %s2630_s7, 512 }
 0x6b6   :  { %p1644_p5 = scmp.ne.s32.totalorder %s2630_s7, %s1643_s30  ;;  %p1647_p6 = scmp.lt.u32.totalorder %s1643_s30, %s2630_s7 }
 0x6b8   :  { %p1649_p7 = pnand %p1647_p6, %p1644_p5 }
 0x6ba   :  { %1652 = shalt.err (!%p1649_p7)
}
 0x6bb   :  { %s1661_s0 = smov 128   ;;  %s1662_s11 = smov 8  }
 0x6bc   :  { %1274 = dma.vmem_to_hbm [thread:$0]  %s1269_s27, 512, %s2630_s7, [#allocation5], %s1661_s0, %s1661_s0, %s1662_s11  }
 0x6bd   :  { %1655 = dma.done.wait [#allocation5], 512  }
 0x6be   :  { %1656 = vsyncadd [#allocation5], 4294966784 }
 0x6bf   :  { %1278 = vsyncpa [#allocation5], 1 }
 0x6c0   :  { %1279 = vsyncmov [#allocation3] }
 0x6c3   :  { %s1280_s1 = vpop.sfrf %1279 }
 0x6c4   :  { %p1314_p8 = scmp.ne.s32.totalorder %s1280_s1, 0 }
 0x6c6   :  { %1284 = shalt.err (%p1314_p8)  }

</bundles_post_ra>
